<compile_context>
chip_gen: v5e
topology: v5e:2x2
jax: 0.10.0
libtpu: 0.0.40
codegen_flags: <defaults>
</compile_context>

<pallas_src>
import functools

import jax
import jax.numpy as jnp
import numpy as np
from jax.experimental import pallas as pl
from jax.experimental.pallas import tpu as pltpu

BN_EPS = 1e-5
LANE = 128


def _round_up(x, m):
    return (x + m - 1) // m * m


def _pick_row_tile(ho, wo, max_m=128):
    """Largest divisor of `ho` with th*wo <= max_m (>=1): output tile ~(128, 128)."""
    best = 1
    for th in range(1, ho + 1):
        if ho % th == 0 and th * wo <= max_m:
            best = th
    return best


# ---------------------------------------------------------------------------
# Fused conv + BN(eval) + ReLU kernel
# ---------------------------------------------------------------------------
def _conv_bn_relu_kernel(x_ref, w_ref, s_ref, b_ref, o_ref,
                         *, kh, kw, stride, th, wo, cin, coutp):
    # x_ref : (1, Hp, Wp, Cin)      bf16  full padded image of one batch element
    # w_ref : (kh, kw, Cin, Coutp)  bf16  lane-padded weights
    # s_ref : (1, Coutp)            f32   folded BN scale
    # b_ref : (1, Coutp)            f32   folded BN bias
    # o_ref : (1, th, Wo, Coutp)    f32   lane-dense output tile
    r = pl.program_id(1)
    row0 = pl.multiple_of(r * (th * stride), th * stride)
    rows_span = (th - 1) * stride + 1
    cols_span = (wo - 1) * stride + 1

    acc = jnp.zeros((th * wo, coutp), jnp.float32)
    for di in range(kh):          # small static loops -> kh*kw accumulated matmuls
        for dj in range(kw):
            xs = x_ref[0, pl.ds(row0 + di, rows_span), pl.ds(dj, cols_span), :]
            if stride > 1:
                # TODO(synk): stride>1 uses a static strided VMEM slice; only
                # stride=1 is exercised by the test below.
                xs = xs[::stride, ::stride, :]
            acc += jnp.dot(xs.reshape(th * wo, cin), w_ref[di, dj],
                           preferred_element_type=jnp.float32)

    # Fused BN (scale/bias, f32) + ReLU epilogue, computed once per tile.
    out = jnp.maximum(acc * s_ref[...] + b_ref[...], 0.0)
    o_ref[...] = out.reshape(1, th, wo, coutp)


# ---------------------------------------------------------------------------
# Wrapper: NCHW in -> NCHW out (matches the PyTorch module)
# ---------------------------------------------------------------------------
def conv_bn_relu(x_nchw, params, *, stride, padding):
    w = params["w"]
    n, cin, h, wdt = x_nchw.shape
    cout, cin_w, kh, kw = w.shape
    assert cin == cin_w
    ho = (h + 2 * padding - kh) // stride + 1
    wo = (wdt + 2 * padding - kw) // stride + 1
    coutp = _round_up(cout, LANE)
    th = _pick_row_tile(ho, wo)

    # NCHW -> NHWC, spatial zero-pad, bf16 operands (accumulation stays f32).
    x = jnp.transpose(x_nchw, (0, 2, 3, 1))
    x = jnp.pad(x, ((0, 0), (padding, padding), (padding, padding), (0, 0)))
    x = x.astype(jnp.bfloat16)
    hp, wp = h + 2 * padding, wdt + 2 * padding

    # (Cout, Cin, kh, kw) -> (kh, kw, Cin, Coutp), lane-padded, bf16.
    w_k = jnp.transpose(w, (2, 3, 1, 0))
    w_k = jnp.pad(w_k, ((0, 0), (0, 0), (0, 0), (0, coutp - cout)))
    w_k = w_k.astype(jnp.bfloat16)

    # Eval-mode BN folded to per-channel scale/bias (kept f32 for the epilogue).
    scale = params["gamma"] / jnp.sqrt(params["var"] + BN_EPS)
    bias = params["beta"] - params["mean"] * scale
    scale = jnp.pad(scale, (0, coutp - cout)).reshape(1, coutp).astype(jnp.float32)
    bias = jnp.pad(bias, (0, coutp - cout)).reshape(1, coutp).astype(jnp.float32)

    kernel = functools.partial(_conv_bn_relu_kernel, kh=kh, kw=kw, stride=stride,
                               th=th, wo=wo, cin=cin, coutp=coutp)

    out = pl.pallas_call(
        kernel,
        out_shape=jax.ShapeDtypeStruct((n, ho, wo, coutp), jnp.float32),
        grid=(n, ho // th),
        in_specs=[
            # Full padded image per batch element; its block index ignores the
            # row-tile axis, so it is DMA'd once per batch and re-used.
            pl.BlockSpec((1, hp, wp, cin), lambda b, r: (b, 0, 0, 0)),
            pl.BlockSpec((kh, kw, cin, coutp), lambda b, r: (0, 0, 0, 0)),
            pl.BlockSpec((1, coutp), lambda b, r: (0, 0)),
            pl.BlockSpec((1, coutp), lambda b, r: (0, 0)),
        ],
        out_specs=pl.BlockSpec((1, th, wo, coutp), lambda b, r: (b, r, 0, 0)),
        compiler_params=pltpu.CompilerParams(
            dimension_semantics=("parallel", "parallel"),
            vmem_limit_bytes=32 * 1024 * 1024,   # safe on v7x's 64 MiB VMEM
        ),
    )(x, w_k, scale, bias)

    out = out[:, :, :, :cout]                 # drop lane padding
    return jnp.transpose(out, (0, 3, 1, 2))   # NHWC -> NCHW


# ---------------------------------------------------------------------------
# Deterministic parameter init (mirrors nn.Conv2d + nn.BatchNorm2d shapes)
# ---------------------------------------------------------------------------
def init_params(key, nin, nout, ksz):
    k1, k2, k3, k4, k5 = jax.random.split(key, 5)
    return dict(
        w=0.1 * jax.random.normal(k1, (nout, nin, ksz, ksz), jnp.float32),
        gamma=1.0 + 0.1 * jax.random.normal(k2, (nout,), jnp.float32),
        beta=0.1 * jax.random.normal(k3, (nout,), jnp.float32),
        mean=0.1 * jax.random.normal(k4, (nout,), jnp.float32),
        var=1.0 + 0.1 * jnp.abs(jax.random.normal(k5, (nout,), jnp.float32)),
    )


# ---------------------------------------------------------------------------
# Pure-JAX references (for correctness check)
# ---------------------------------------------------------------------------
def _ref_conv_bn_relu(x_nchw, params, *, stride, padding, cast_bf16):
    w = params["w"]
    if cast_bf16:  # match the kernel's bf16 operand rounding (f32 accumulation)
        x_nchw = x_nchw.astype(jnp.bfloat16).astype(jnp.float32)
        w = w.astype(jnp.bfloat16).astype(jnp.float32)
    y = jax.lax.conv_general_dilated(
        x_nchw, w, window_strides=(stride, stride),
        padding=[(padding, padding), (padding, padding)],
        dimension_numbers=("NCHW", "OIHW", "NCHW"))
    scale = params["gamma"] / jnp.sqrt(params["var"] + BN_EPS)
    bias = params["beta"] - params["mean"] * scale
    return jnp.maximum(y * scale[None, :, None, None] + bias[None, :, None, None], 0.0)


if __name__ == "__main__":
    key = jax.random.PRNGKey(0)
    kx, kp = jax.random.split(key)

    # conv_bn_relu(nin=4, nout=32, kernel_size=3, stride=1, padding=1)
    x = jax.random.normal(kx, (2, 4, 16, 16), jnp.float32)   # NCHW
    params = init_params(kp, nin=4, nout=32, ksz=3)

    out = jax.block_until_ready(conv_bn_relu(x, params, stride=1, padding=1))
    assert out.shape == (2, 32, 16, 16), out.shape

    # Tight check vs. reference with the same bf16 operand rounding.
    ref_bf16 = _ref_conv_bn_relu(x, params, stride=1, padding=1, cast_bf16=True)
    np.testing.assert_allclose(np.asarray(out), np.asarray(ref_bf16),
                               rtol=1e-3, atol=1e-3)
    # Loose sanity check vs. the full-f32 PyTorch-equivalent math.
    ref_f32 = _ref_conv_bn_relu(x, params, stride=1, padding=1, cast_bf16=False)
    np.testing.assert_allclose(np.asarray(out), np.asarray(ref_f32),
                               rtol=1e-1, atol=1e-1)

    print("KERNEL_OK")
</pallas_src>

<mosaic_0001>
module attributes {stable_mosaic.version = 11 : i64} {
  func.func @_conv_bn_relu_kernel(%arg0: i32, %arg1: i32, %arg2: memref<1x18x18x4xbf16, #tpu.memory_space<vmem>>, %arg3: memref<3x3x4x128xbf16, #tpu.memory_space<vmem>>, %arg4: memref<1x128xf32, #tpu.memory_space<vmem>>, %arg5: memref<1x128xf32, #tpu.memory_space<vmem>>, %arg6: memref<1x8x16x128xf32, #tpu.memory_space<vmem>>) attributes {dimension_semantics = [#tpu.dimension_semantics<parallel>, #tpu.dimension_semantics<parallel>], iteration_bounds = array<i64: 2, 2>, scalar_prefetch = 0 : i64, scratch_operands = 0 : i64, tpu.core_type = #tpu.core_type<tc>, window_params = [{transform_indices = @transform_0, window_bounds = array<i64: 1, 18, 18, 4>}, {pipeline_mode = #tpu.pipeline_mode<synchronous>, transform_indices = @transform_1, window_bounds = array<i64: 3, 3, 4, 128>}, {pipeline_mode = #tpu.pipeline_mode<synchronous>, transform_indices = @transform_2, window_bounds = array<i64: 1, 128>}, {pipeline_mode = #tpu.pipeline_mode<synchronous>, transform_indices = @transform_3, window_bounds = array<i64: 1, 128>}, {transform_indices = @transform_4, window_bounds = array<i64: 1, 8, 16, 128>}]} {
    %c8_i32 = arith.constant 8 : i32
    %0 = arith.muli %arg1, %c8_i32 : i32
    %1 = tpu.assume_multiple %0, 8 : i32
    %cst = arith.constant 0.000000e+00 : f32
    %2 = vector.broadcast %cst : f32 to vector<128x128xf32>
    %c0_i32 = arith.constant 0 : i32
    %3 = arith.addi %1, %c0_i32 : i32
    %c0 = arith.constant 0 : index
    %4 = arith.index_cast %3 : i32 to index
    %c0_0 = arith.constant 0 : index
    %c0_1 = arith.constant 0 : index
    %5 = vector.load %arg2[%c0, %4, %c0_0, %c0_1] : memref<1x18x18x4xbf16, #tpu.memory_space<vmem>>, vector<1x8x16x4xbf16>
    %6 = vector.shape_cast %5 : vector<1x8x16x4xbf16> to vector<8x16x4xbf16>
    %7 = vector.shape_cast %6 : vector<8x16x4xbf16> to vector<128x4xbf16>
    %c0_2 = arith.constant 0 : index
    %c0_3 = arith.constant 0 : index
    %c0_4 = arith.constant 0 : index
    %c0_5 = arith.constant 0 : index
    %8 = vector.load %arg3[%c0_2, %c0_3, %c0_4, %c0_5] : memref<3x3x4x128xbf16, #tpu.memory_space<vmem>>, vector<1x1x4x128xbf16>
    %9 = vector.shape_cast %8 : vector<1x1x4x128xbf16> to vector<4x128xbf16>
    %cst_6 = arith.constant dense<0.000000e+00> : vector<128x128xf32>
    %10 = tpu.matmul %7, %9, %cst_6 {dimension_numbers = #tpu.dot_dimension_numbers<[1], [0], [0], [1], [0, 0, 1, 1], [], []>} : vector<128x4xbf16>, vector<4x128xbf16>, vector<128x128xf32> -> vector<128x128xf32>
    %11 = arith.addf %2, %10 : vector<128x128xf32>
    %c0_i32_7 = arith.constant 0 : i32
    %12 = arith.addi %1, %c0_i32_7 : i32
    %c0_8 = arith.constant 0 : index
    %13 = arith.index_cast %12 : i32 to index
    %c1 = arith.constant 1 : index
    %c0_9 = arith.constant 0 : index
    %14 = vector.load %arg2[%c0_8, %13, %c1, %c0_9] : memref<1x18x18x4xbf16, #tpu.memory_space<vmem>>, vector<1x8x16x4xbf16>
    %15 = vector.shape_cast %14 : vector<1x8x16x4xbf16> to vector<8x16x4xbf16>
    %16 = vector.shape_cast %15 : vector<8x16x4xbf16> to vector<128x4xbf16>
    %c0_10 = arith.constant 0 : index
    %c1_11 = arith.constant 1 : index
    %c0_12 = arith.constant 0 : index
    %c0_13 = arith.constant 0 : index
    %17 = vector.load %arg3[%c0_10, %c1_11, %c0_12, %c0_13] : memref<3x3x4x128xbf16, #tpu.memory_space<vmem>>, vector<1x1x4x128xbf16>
    %18 = vector.shape_cast %17 : vector<1x1x4x128xbf16> to vector<4x128xbf16>
    %cst_14 = arith.constant dense<0.000000e+00> : vector<128x128xf32>
    %19 = tpu.matmul %16, %18, %cst_14 {dimension_numbers = #tpu.dot_dimension_numbers<[1], [0], [0], [1], [0, 0, 1, 1], [], []>} : vector<128x4xbf16>, vector<4x128xbf16>, vector<128x128xf32> -> vector<128x128xf32>
    %20 = arith.addf %11, %19 : vector<128x128xf32>
    %c0_i32_15 = arith.constant 0 : i32
    %21 = arith.addi %1, %c0_i32_15 : i32
    %c0_16 = arith.constant 0 : index
    %22 = arith.index_cast %21 : i32 to index
    %c2 = arith.constant 2 : index
    %c0_17 = arith.constant 0 : index
    %23 = vector.load %arg2[%c0_16, %22, %c2, %c0_17] : memref<1x18x18x4xbf16, #tpu.memory_space<vmem>>, vector<1x8x16x4xbf16>
    %24 = vector.shape_cast %23 : vector<1x8x16x4xbf16> to vector<8x16x4xbf16>
    %25 = vector.shape_cast %24 : vector<8x16x4xbf16> to vector<128x4xbf16>
    %c0_18 = arith.constant 0 : index
    %c2_19 = arith.constant 2 : index
    %c0_20 = arith.constant 0 : index
    %c0_21 = arith.constant 0 : index
    %26 = vector.load %arg3[%c0_18, %c2_19, %c0_20, %c0_21] : memref<3x3x4x128xbf16, #tpu.memory_space<vmem>>, vector<1x1x4x128xbf16>
    %27 = vector.shape_cast %26 : vector<1x1x4x128xbf16> to vector<4x128xbf16>
    %cst_22 = arith.constant dense<0.000000e+00> : vector<128x128xf32>
    %28 = tpu.matmul %25, %27, %cst_22 {dimension_numbers = #tpu.dot_dimension_numbers<[1], [0], [0], [1], [0, 0, 1, 1], [], []>} : vector<128x4xbf16>, vector<4x128xbf16>, vector<128x128xf32> -> vector<128x128xf32>
    %29 = arith.addf %20, %28 : vector<128x128xf32>
    %c1_i32 = arith.constant 1 : i32
    %30 = arith.addi %1, %c1_i32 : i32
    %c0_23 = arith.constant 0 : index
    %31 = arith.index_cast %30 : i32 to index
    %c0_24 = arith.constant 0 : index
    %c0_25 = arith.constant 0 : index
    %32 = vector.load %arg2[%c0_23, %31, %c0_24, %c0_25] : memref<1x18x18x4xbf16, #tpu.memory_space<vmem>>, vector<1x8x16x4xbf16>
    %33 = vector.shape_cast %32 : vector<1x8x16x4xbf16> to vector<8x16x4xbf16>
    %34 = vector.shape_cast %33 : vector<8x16x4xbf16> to vector<128x4xbf16>
    %c1_26 = arith.constant 1 : index
    %c0_27 = arith.constant 0 : index
    %c0_28 = arith.constant 0 : index
    %c0_29 = arith.constant 0 : index
    %35 = vector.load %arg3[%c1_26, %c0_27, %c0_28, %c0_29] : memref<3x3x4x128xbf16, #tpu.memory_space<vmem>>, vector<1x1x4x128xbf16>
    %36 = vector.shape_cast %35 : vector<1x1x4x128xbf16> to vector<4x128xbf16>
    %cst_30 = arith.constant dense<0.000000e+00> : vector<128x128xf32>
    %37 = tpu.matmul %34, %36, %cst_30 {dimension_numbers = #tpu.dot_dimension_numbers<[1], [0], [0], [1], [0, 0, 1, 1], [], []>} : vector<128x4xbf16>, vector<4x128xbf16>, vector<128x128xf32> -> vector<128x128xf32>
    %38 = arith.addf %29, %37 : vector<128x128xf32>
    %c1_i32_31 = arith.constant 1 : i32
    %39 = arith.addi %1, %c1_i32_31 : i32
    %c0_32 = arith.constant 0 : index
    %40 = arith.index_cast %39 : i32 to index
    %c1_33 = arith.constant 1 : index
    %c0_34 = arith.constant 0 : index
    %41 = vector.load %arg2[%c0_32, %40, %c1_33, %c0_34] : memref<1x18x18x4xbf16, #tpu.memory_space<vmem>>, vector<1x8x16x4xbf16>
    %42 = vector.shape_cast %41 : vector<1x8x16x4xbf16> to vector<8x16x4xbf16>
    %43 = vector.shape_cast %42 : vector<8x16x4xbf16> to vector<128x4xbf16>
    %c1_35 = arith.constant 1 : index
    %c1_36 = arith.constant 1 : index
    %c0_37 = arith.constant 0 : index
    %c0_38 = arith.constant 0 : index
    %44 = vector.load %arg3[%c1_35, %c1_36, %c0_37, %c0_38] : memref<3x3x4x128xbf16, #tpu.memory_space<vmem>>, vector<1x1x4x128xbf16>
    %45 = vector.shape_cast %44 : vector<1x1x4x128xbf16> to vector<4x128xbf16>
    %cst_39 = arith.constant dense<0.000000e+00> : vector<128x128xf32>
    %46 = tpu.matmul %43, %45, %cst_39 {dimension_numbers = #tpu.dot_dimension_numbers<[1], [0], [0], [1], [0, 0, 1, 1], [], []>} : vector<128x4xbf16>, vector<4x128xbf16>, vector<128x128xf32> -> vector<128x128xf32>
    %47 = arith.addf %38, %46 : vector<128x128xf32>
    %c1_i32_40 = arith.constant 1 : i32
    %48 = arith.addi %1, %c1_i32_40 : i32
    %c0_41 = arith.constant 0 : index
    %49 = arith.index_cast %48 : i32 to index
    %c2_42 = arith.constant 2 : index
    %c0_43 = arith.constant 0 : index
    %50 = vector.load %arg2[%c0_41, %49, %c2_42, %c0_43] : memref<1x18x18x4xbf16, #tpu.memory_space<vmem>>, vector<1x8x16x4xbf16>
    %51 = vector.shape_cast %50 : vector<1x8x16x4xbf16> to vector<8x16x4xbf16>
    %52 = vector.shape_cast %51 : vector<8x16x4xbf16> to vector<128x4xbf16>
    %c1_44 = arith.constant 1 : index
    %c2_45 = arith.constant 2 : index
    %c0_46 = arith.constant 0 : index
    %c0_47 = arith.constant 0 : index
    %53 = vector.load %arg3[%c1_44, %c2_45, %c0_46, %c0_47] : memref<3x3x4x128xbf16, #tpu.memory_space<vmem>>, vector<1x1x4x128xbf16>
    %54 = vector.shape_cast %53 : vector<1x1x4x128xbf16> to vector<4x128xbf16>
    %cst_48 = arith.constant dense<0.000000e+00> : vector<128x128xf32>
    %55 = tpu.matmul %52, %54, %cst_48 {dimension_numbers = #tpu.dot_dimension_numbers<[1], [0], [0], [1], [0, 0, 1, 1], [], []>} : vector<128x4xbf16>, vector<4x128xbf16>, vector<128x128xf32> -> vector<128x128xf32>
    %56 = arith.addf %47, %55 : vector<128x128xf32>
    %c2_i32 = arith.constant 2 : i32
    %57 = arith.addi %1, %c2_i32 : i32
    %c0_49 = arith.constant 0 : index
    %58 = arith.index_cast %57 : i32 to index
    %c0_50 = arith.constant 0 : index
    %c0_51 = arith.constant 0 : index
    %59 = vector.load %arg2[%c0_49, %58, %c0_50, %c0_51] : memref<1x18x18x4xbf16, #tpu.memory_space<vmem>>, vector<1x8x16x4xbf16>
    %60 = vector.shape_cast %59 : vector<1x8x16x4xbf16> to vector<8x16x4xbf16>
    %61 = vector.shape_cast %60 : vector<8x16x4xbf16> to vector<128x4xbf16>
    %c2_52 = arith.constant 2 : index
    %c0_53 = arith.constant 0 : index
    %c0_54 = arith.constant 0 : index
    %c0_55 = arith.constant 0 : index
    %62 = vector.load %arg3[%c2_52, %c0_53, %c0_54, %c0_55] : memref<3x3x4x128xbf16, #tpu.memory_space<vmem>>, vector<1x1x4x128xbf16>
    %63 = vector.shape_cast %62 : vector<1x1x4x128xbf16> to vector<4x128xbf16>
    %cst_56 = arith.constant dense<0.000000e+00> : vector<128x128xf32>
    %64 = tpu.matmul %61, %63, %cst_56 {dimension_numbers = #tpu.dot_dimension_numbers<[1], [0], [0], [1], [0, 0, 1, 1], [], []>} : vector<128x4xbf16>, vector<4x128xbf16>, vector<128x128xf32> -> vector<128x128xf32>
    %65 = arith.addf %56, %64 : vector<128x128xf32>
    %c2_i32_57 = arith.constant 2 : i32
    %66 = arith.addi %1, %c2_i32_57 : i32
    %c0_58 = arith.constant 0 : index
    %67 = arith.index_cast %66 : i32 to index
    %c1_59 = arith.constant 1 : index
    %c0_60 = arith.constant 0 : index
    %68 = vector.load %arg2[%c0_58, %67, %c1_59, %c0_60] : memref<1x18x18x4xbf16, #tpu.memory_space<vmem>>, vector<1x8x16x4xbf16>
    %69 = vector.shape_cast %68 : vector<1x8x16x4xbf16> to vector<8x16x4xbf16>
    %70 = vector.shape_cast %69 : vector<8x16x4xbf16> to vector<128x4xbf16>
    %c2_61 = arith.constant 2 : index
    %c1_62 = arith.constant 1 : index
    %c0_63 = arith.constant 0 : index
    %c0_64 = arith.constant 0 : index
    %71 = vector.load %arg3[%c2_61, %c1_62, %c0_63, %c0_64] : memref<3x3x4x128xbf16, #tpu.memory_space<vmem>>, vector<1x1x4x128xbf16>
    %72 = vector.shape_cast %71 : vector<1x1x4x128xbf16> to vector<4x128xbf16>
    %cst_65 = arith.constant dense<0.000000e+00> : vector<128x128xf32>
    %73 = tpu.matmul %70, %72, %cst_65 {dimension_numbers = #tpu.dot_dimension_numbers<[1], [0], [0], [1], [0, 0, 1, 1], [], []>} : vector<128x4xbf16>, vector<4x128xbf16>, vector<128x128xf32> -> vector<128x128xf32>
    %74 = arith.addf %65, %73 : vector<128x128xf32>
    %c2_i32_66 = arith.constant 2 : i32
    %75 = arith.addi %1, %c2_i32_66 : i32
    %c0_67 = arith.constant 0 : index
    %76 = arith.index_cast %75 : i32 to index
    %c2_68 = arith.constant 2 : index
    %c0_69 = arith.constant 0 : index
    %77 = vector.load %arg2[%c0_67, %76, %c2_68, %c0_69] : memref<1x18x18x4xbf16, #tpu.memory_space<vmem>>, vector<1x8x16x4xbf16>
    %78 = vector.shape_cast %77 : vector<1x8x16x4xbf16> to vector<8x16x4xbf16>
    %79 = vector.shape_cast %78 : vector<8x16x4xbf16> to vector<128x4xbf16>
    %c2_70 = arith.constant 2 : index
    %c2_71 = arith.constant 2 : index
    %c0_72 = arith.constant 0 : index
    %c0_73 = arith.constant 0 : index
    %80 = vector.load %arg3[%c2_70, %c2_71, %c0_72, %c0_73] : memref<3x3x4x128xbf16, #tpu.memory_space<vmem>>, vector<1x1x4x128xbf16>
    %81 = vector.shape_cast %80 : vector<1x1x4x128xbf16> to vector<4x128xbf16>
    %cst_74 = arith.constant dense<0.000000e+00> : vector<128x128xf32>
    %82 = tpu.matmul %79, %81, %cst_74 {dimension_numbers = #tpu.dot_dimension_numbers<[1], [0], [0], [1], [0, 0, 1, 1], [], []>} : vector<128x4xbf16>, vector<4x128xbf16>, vector<128x128xf32> -> vector<128x128xf32>
    %83 = arith.addf %74, %82 : vector<128x128xf32>
    %c0_75 = arith.constant 0 : index
    %c0_76 = arith.constant 0 : index
    %84 = vector.load %arg4[%c0_75, %c0_76] : memref<1x128xf32, #tpu.memory_space<vmem>>, vector<1x128xf32>
    %85 = vector.broadcast %84 : vector<1x128xf32> to vector<128x128xf32>
    %86 = arith.mulf %83, %85 : vector<128x128xf32>
    %c0_77 = arith.constant 0 : index
    %c0_78 = arith.constant 0 : index
    %87 = vector.load %arg5[%c0_77, %c0_78] : memref<1x128xf32, #tpu.memory_space<vmem>>, vector<1x128xf32>
    %88 = vector.broadcast %87 : vector<1x128xf32> to vector<128x128xf32>
    %89 = arith.addf %86, %88 : vector<128x128xf32>
    %cst_79 = arith.constant 0.000000e+00 : f32
    %90 = vector.broadcast %cst_79 : f32 to vector<128x128xf32>
    %91 = arith.maximumf %89, %90 : vector<128x128xf32>
    %92 = vector.shape_cast %91 : vector<128x128xf32> to vector<1x8x16x128xf32>
    %c0_80 = arith.constant 0 : index
    %c0_81 = arith.constant 0 : index
    %c0_82 = arith.constant 0 : index
    %c0_83 = arith.constant 0 : index
    %93 = vector.load %arg6[%c0_80, %c0_81, %c0_82, %c0_83] : memref<1x8x16x128xf32, #tpu.memory_space<vmem>>, vector<1x8x16x128xf32>
    tpu.vector_store %arg6[%c0_80, %c0_81, %c0_82, %c0_83], %92 {strides = array<i32>} : memref<1x8x16x128xf32, #tpu.memory_space<vmem>>, vector<1x8x16x128xf32>,
    return
  }
  func.func @transform_0(%arg0: i32, %arg1: i32) -> (i32, i32, i32, i32) {
    %c0_i32 = arith.constant 0 : i32
    %c0_i32_0 = arith.constant 0 : i32
    %c0_i32_1 = arith.constant 0 : i32
    %c0_i32_2 = arith.constant 0 : i32
    return %arg0, %c0_i32, %c0_i32_0, %c0_i32_1 : i32, i32, i32, i32
  }
  func.func @transform_1(%arg0: i32, %arg1: i32) -> (i32, i32, i32, i32) {
    %c0_i32 = arith.constant 0 : i32
    %c0_i32_0 = arith.constant 0 : i32
    %c0_i32_1 = arith.constant 0 : i32
    %c0_i32_2 = arith.constant 0 : i32
    %c0_i32_3 = arith.constant 0 : i32
    return %c0_i32, %c0_i32_0, %c0_i32_1, %c0_i32_2 : i32, i32, i32, i32
  }
  func.func @transform_2(%arg0: i32, %arg1: i32) -> (i32, i32) {
    %c0_i32 = arith.constant 0 : i32
    %c0_i32_0 = arith.constant 0 : i32
    %c0_i32_1 = arith.constant 0 : i32
    return %c0_i32, %c0_i32_0 : i32, i32
  }
  func.func @transform_3(%arg0: i32, %arg1: i32) -> (i32, i32) {
    %c0_i32 = arith.constant 0 : i32
    %c0_i32_0 = arith.constant 0 : i32
    %c0_i32_1 = arith.constant 0 : i32
    return %c0_i32, %c0_i32_0 : i32, i32
  }
  func.func @transform_4(%arg0: i32, %arg1: i32) -> (i32, i32, i32, i32) {
    %c0_i32 = arith.constant 0 : i32
    %c0_i32_0 = arith.constant 0 : i32
    %c0_i32_1 = arith.constant 0 : i32
    return %arg0, %arg1, %c0_i32, %c0_i32_0 : i32, i32, i32, i32
  }
}

</mosaic_0001>

<bundles_post_ra>
// kernel: tpu_custom_call.1
= control target key start
LH: loop header
LB: loop body
LE: loop exit
PB: predicated region body
PF: predicated region fallthrough
CT: control target
= control target key end

     0   :  { %9 = vsyncpa [#allocation3], 0  ;;  %s3888_s0 = inlined_call_operand.vmem [shape: bf16[2,18,18,4], index: 0, kind: input, shape index: {}]   ;;  %s3889_s1 = inlined_call_operand.vmem [shape: bf16[3,3,4,128], index: 1, kind: input, shape index: {}]   ;;  %s3890_s2 = inlined_call_operand.vmem [shape: f32[1,128], index: 2, kind: input, shape index: {}]   ;;  %s3891_s3 = inlined_call_operand.vmem [shape: f32[1,128], index: 3, kind: input, shape index: {}]   ;;  %s3892_s4 = inlined_call_operand.hbm [shape: f32[2,16,16,128], index: 4, kind: output, shape index: {}]  }
   0x1   :  { %11 = vsyncpa [#allocation3 + $0x1], 0  ;;  %s2967_s15 = smov 0   ;;  %s2969_s16 = smov 0  }
   0x2   :  { %s2971_s17 = smov 0   ;;  %s2973_s18 = smov 0  }
   0x3   :  { %s2975_s19 = smov 0   ;;  %s2977_s20 = smov 0  }
   0x4   :  { %s2979_s21 = smov 0   ;;  %s2981_s22 = smov 0  }
   0x5 LB: > { %s2422_s23 = sadd.s32 4294967295, %s2938_s22   ;;  %s2423_s24 = sadd.s32 4294967294, %s2938_s22   ;;  %s2938_s22 = sphi %s2981_s22, %s17_s22   ;;  %s2934_s21 = sphi %s2979_s21, %s3905_s21   ;;  %s2930_s20 = sphi %s2977_s20, %s3904_s20   ;;  %s2926_s19 = sphi %s2975_s19, %s3903_s19   ;;  %s2922_s18 = sphi %s2973_s18, %s3902_s18   ;;  %s2918_s17 = sphi %s2971_s17, %s3901_s17   ;;  %s2914_s16 = sphi %s2969_s16, %s3900_s16   ;;  %s2910_s15 = sphi %s2967_s15, %s3899_s15  }
   0x6   : > { %s26_s25 = sadd.s32 1, %s2930_s20  ;;  %s29_s26 = sadd.s32 1, %s2934_s21 }
   0x7   : > { %p27_p0 = scmp.ge.s32.totalorder %s26_s25, 2  ;;  %p137_p1 = scmp.ne.s32.totalorder %s2918_s17, %s2914_s16 }
   0x8   : > { %p138_p2 = scmp.eq.s32.totalorder %s2422_s23, 3  ;;  %p143_p5 = scmp.ne.s32.totalorder %s2914_s16, %s2910_s15 }
   0x9   : > { %s3907_s25 = smov (%p27_p0, %s26_s25), 0  ;;  %s3909_s26 = smov (!%p27_p0, %s29_s26), %s2934_s21 }
   0xa   : > { %s123_s27 = ssub.s32 %s2930_s20, %s3907_s25  ;;  %p3018_p3 = por %p138_p2, %p137_p1 }
   0xb   : > { %p31_p4 = scmp.ge.s32.totalorder %s3909_s26, 2  ;;  %p144_p6 = scmp.eq.s32.totalorder %s2423_s24, 3 }
   0xc   : > { %p2426_p7 = scmp.ge.s32.totalorder %s2938_s22, 1  ;;  %p179_p9 = scmp.lt.s32.totalorder %s2938_s22, 5 }
   0xd   : > { %s3911_s26 = smov (%p31_p4, %s3909_s26), 0  ;;  %p3027_p8 = por %p144_p6, %p143_p5 }
   0xe   : > { %s122_s30 = ssub.s32 %s2934_s21, %s3911_s26  ;;  %s127_s5 = sadd.s32 1, %s2918_s17 }
   0xf   : > { %s124_s6 = sor.u32 %s123_s27, %s122_s30  ;;  %p180_p10 = pnand %p2426_p7, %p179_p9 }
  0x10   : > { %p125_p11 = scmp.eq.s32.totalorder %s124_s6, 0  ;;  %p205_p12 = scmp.lt.s32.totalorder (!%p180_p10), %s2926_s19, 1 }
  0x11   : > { %183 = sbr.rel (%p180_p10) target bundleno = 480 (0x1e0), region = 36  ;;  %s202_s9 = sand.u32 (!%p180_p10), 1, %s2914_s16  }
  0x12   : > { %s3036_s7 = scalar_select %p125_p11, %s2918_s17, %s127_s5  }
  0x13   : > { %s2739_s13 = smul.u32 (!%p180_p10), 96, %s2922_s18  ;;  %s2427_s12 = sshll.u32 (!%p180_p10), %s202_s9, 7 }
  0x14   : > { %s2735_s23 = sshll.u32 (!%p180_p10), %s2926_s19, 5  ;;  %s2318_s8 = scalar_lea.sflag (!%p180_p10), [#allocation3], %s202_s9 }
  0x16   : > { %v2432_v0 = vld [vmem:[%s3889_s1 + $0x2] sm:$0x3]  ;;  %vm487_vm0 = vcmask 1041408   ;;  %s206_s10 = scalar_select %p205_p12, %s2926_s19, 1  ;;  %v2489_v2 = vld [vmem:[%s3889_s1 + $0x4] sm:$0x3] }
  0x17   : > { %v489_v1 = vsel %vm487_vm0, %v2432_v0, 0  ;;  %v790_v3 = vsel %vm487_vm0, %v2489_v2, 0  ;;  %v2516_v4 = vld [vmem:[%s3889_s1 + $0x6] sm:$0x3]  ;;  %v232_v5 = vld [vmem:[%s3889_s1] sm:$0x3] }
  0x18   : > { %2765 = vmatpush.bf16.msra.mxu1 %v489_v1  ;;  %2766 = vmatpush.bf16.msra.mxu2 %v489_v1  ;;  %s2768_s14 = smul.u32 216, %s206_s10  ;;  %v944_v6 = vsel %vm487_vm0, %v2516_v4, 0  ;;  %v605_v7 = vsel %vm487_vm0, %v232_v5, 0  ;;  %v2581_v8 = vld [vmem:[%s3889_s1 + $0x8] sm:$0x3]  ;;  %vm462_vm3 = vcmask 31744  }
  0x19   : > { %2767 = vmatpush.bf16.msra.mxu3 %v489_v1  ;;  %498 = vmatpush.bf16.msra.mxu0 %v489_v1  ;;  %v1278_v9 = vsel %vm487_vm0, %v2581_v8, 0  ;;  %vm241_vm1 = vsmask.f32 3328  ;;  %vm242_vm2 = vsmask.f32 7440  ;;  %vm680_vm5 = vcmask 1042432  }
  0x1a   : > { %s209_s10 = scalar_lea.vmem %s3888_s0, %s2768_s14  ;;  %vm3092_vm4 = vmor %vm241_vm1, %vm242_vm2  ;;  %vm681_vm6 = vcmask 1046532   ;;  %s2764_s14 = sshll.u32 %s2922_s18, 4 }
  0x1b   : > { %s3064_s11 = scalar_lea.vmem %s209_s10, %s2739_s13  ;;  %vm3200_vm7 = vmor %vm680_vm5, %vm681_vm6  ;;  %s3780_s13 = scalar_lea.vmem [#allocation2], %s2427_s12 }
  0x1c   : > { %799 = vmatpush.bf16.msrb.mxu2 %v790_v3  ;;  %614 = vmatpush.bf16.msrb.mxu1 %v605_v7  ;;  %v220_v10 = vld [vmem:[%s3064_s11 + $0x18] sm:$0xf]  ;;  %v3068_v11 = vld [vmem:[%s3064_s11 + $0x1c] sm:$0xf]  ;;  %v3071_v12 = vld [vmem:[%s3064_s11 + $0x20] sm:$0x1]  ;;  %s2330_s24 = sadd.s32 %s2764_s14, %s2735_s23 }
  0x1d   : > { %953 = vmatpush.bf16.msrb.mxu3 %v944_v6  ;;  %1287 = vmatpush.bf16.msrb.mxu0 %v1278_v9  ;;  %v293_v13 = vshrl.u32 %v220_v10, 16  ;;  %v296_v14 = vshll.u32 %v220_v10, 16  ;;  %v302_v15 = vshll.u32 %v3068_v11, 16  ;;  %v306_v16 = vshrl.u32 %v3068_v11, 16  ;;  %v224_v17 = vld [vmem:[%s3064_s11 + $0x30] sm:$0xf] }
  0x1e   : > { %v312_v18 = vshll.u32 %v3071_v12, 16  ;;  %v3078_v19 = vld [vmem:[%s3064_s11 + $0x34] sm:$0xf]  ;;  %v3081_v20 = vld [vmem:[%s3064_s11 + $0x38] sm:$0x1]  ;;  %v341_v21 = vshrl.u32 %v224_v17, 16 }
  0x1f   : > { %v295_v22 = vrot.slane %v293_v13, 4  ;;  %v298_v23 = vrot.slane %v296_v14, 5  ;;  %v304_v24 = vrot.slane %v302_v15, 5  ;;  %v308_v25 = vrot.slane %v306_v16, 4  ;;  %v228_v26 = vld [vmem:[%s3064_s11 + $0x48] sm:$0xf] }
  0x20   : > { %v314_v27 = vrot.slane %v312_v18, 5  ;;  %v343_v28 = vrot.slane %v341_v21, 4  ;;  %v344_v29 = vshll.u32 %v224_v17, 16  ;;  %v350_v30 = vshll.u32 %v3078_v19, 16  ;;  %v3088_v35 = vld [vmem:[%s3064_s11 + $0x4c] sm:$0xf] }
  0x21   : > { %v299_v31 = vor.u32 %v298_v23, %v295_v22  ;;  %v309_v32 = vor.u32 %v308_v25, %v304_v24  ;;  %v354_v33 = vshrl.u32 %v3078_v19, 16  ;;  %v360_v34 = vshll.u32 %v3081_v20, 16  ;;  %v3097_v46 = vld [vmem:[%s3064_s11 + $0x50] sm:$0x1]  ;;  %v216_v54 = vld [vmem:[%s3064_s11] sm:$0xf] }
  0x22   : > { %v346_v37 = vrot.slane %v344_v29, 5  ;;  %v352_v38 = vrot.slane %v350_v30, 5  ;;  %v389_v39 = vshrl.u32 %v228_v26, 16  ;;  %v392_v40 = vshll.u32 %v228_v26, 16  ;;  %v3110_v2 = vld [vmem:[%s3064_s11 + $0x4] sm:$0xf] }
  0x23   : > { %v300_v41 = vrot.slane %v299_v31, 4  ;;  %v310_v42 = vrot.slane %v309_v32, 4  ;;  %v356_v43 = vrot.slane %v354_v33, 4  ;;  %v362_v44 = vrot.slane %v360_v34, 5  ;;  %v3115_v8 = vld [vmem:[%s3064_s11 + $0x8] sm:$0x1] }
  0x24   : > { %v347_v45 = vor.u32 %v346_v37, %v343_v28  ;;  %v391_v47 = vrot.slane %v389_v39, 4  ;;  %v394_v48 = vrot.slane %v392_v40, 5  ;;  %v398_v49 = vshll.u32 %v3088_v35, 16  ;;  %v222_v15 = vld [vmem:[%s3064_s11 + $0x24] sm:$0xf]  ;;  %s2736_s27 = sshll.u32 %s2330_s24, 3 }
  0x25   : > { %v305_v50 = vsel %vm3092_vm4, %v300_v41, %v304_v24  ;;  %v315_v51 = vsel %vm3092_vm4, %v310_v42, %v314_v27  ;;  %v357_v52 = vor.u32 %v356_v43, %v352_v38  ;;  %v402_v53 = vshrl.u32 %v3088_v35, 16  ;;  %v3126_v26 = vld [vmem:[%s3064_s11 + $0x28] sm:$0xf]  ;;  %v3131_v30 = vld [vmem:[%s3064_s11 + $0x2c] sm:$0x1]  ;;  %s2332_s30 = scalar_lea.hbm %s3892_s4, %s2736_s27  ;;  %s2333_s5 = sshll.u32 %s3780_s13, 4  ;;  %s2334_s5 = int_to_ptr.vmem [resolvable:$true] %s2333_s5 }
  0x26   : > { %v442_v55 = vunpack.c.l.b16 %v305_v50  ;;  %v443_v56 = vunpack.c.l.b16 %v315_v51  ;;  %v348_v57 = vrot.slane %v347_v45, 4  ;;  %v395_v58 = vor.u32 %v394_v48, %v391_v47  ;;  %v3139_v51 = vld [vmem:[%s3064_s11 + $0x40] sm:$0xf]  ;;  %s2335_s6 = sshll.u32 %s2332_s30, 4  ;;  %s2864_s23 = scalar_lea.hbm %s3892_s4, 512  ;;  %s2336_s6 = int_to_ptr.hbm [resolvable:$true] %s2335_s6 }
  0x27   : > { %v358_v59 = vrot.slane %v357_v52, 4  ;;  %v400_v60 = vrot.slane %v398_v49, 5  ;;  %v404_v61 = vrot.slane %v402_v53, 4  ;;  %v408_v62 = vshll.u32 %v3097_v46, 16  ;;  %s2858_s10 = sshra.s32 %s2336_s6, 4  ;;  %s2859_s10 = int_to_ptr.hbm [resolvable:$true] %s2858_s10 }
  0x28   : > { %v456_v63 = vpack.c.b16 %v443_v56, %v442_v55  ;;  %v353_v0 = vsel %vm3092_vm4, %v348_v57, %v352_v38  ;;  %v396_v1 = vrot.slane %v395_v58, 4  ;;  %v245_v3 = vshrl.u32 %v216_v54, 16  ;;  %v226_v38 = vld [vmem:[%s3064_s11 + $0x3c] sm:$0xf]  ;;  %v3145_v56 = vld [vmem:[%s3064_s11 + $0x44] sm:$0x1]  ;;  %p2865_p2 = scmp.lt.s32.totalorder %s2859_s10, %s3892_s4 }
  0x29   : > { %v363_v4 = vsel %vm3092_vm4, %v358_v59, %v362_v44  ;;  %v446_v5 = vunpack.c.l.b16 %v353_v0  ;;  %v405_v6 = vor.u32 %v404_v61, %v400_v60  ;;  %v410_v7 = vrot.slane %v408_v62, 5  ;;  %v230_v58 = vld [vmem:[%s3064_s11 + $0x54] sm:$0xf] }
  0x2a   : > { %2435 = vmatmul.msk.bf16.vlgmr.msra.gmra.mxu1 %vm462_vm3, %v456_v63  ;;  %v447_v9 = vunpack.c.l.b16 %v363_v4  ;;  %v401_v10 = vsel %vm3092_vm4, %v396_v1, %v400_v60  ;;  %v247_v13 = vrot.slane %v245_v3, 4  ;;  %v248_v14 = vshll.u32 %v216_v54, 16 }
  0x2b   : > { %v406_v16 = vrot.slane %v405_v6, 4  ;;  %v450_v17 = vunpack.c.l.b16 %v401_v10  ;;  %v254_v18 = vshll.u32 %v3110_v2, 16  ;;  %v258_v21 = vshrl.u32 %v3110_v2, 16 }
  0x2c   : > { %v458_v22 = vpack.c.b16 %v447_v9, %v446_v5  ;;  %v250_v23 = vrot.slane %v248_v14, 5  ;;  %v264_v24 = vshll.u32 %v3115_v8, 16  ;;  %v688_v25 = vrot.slane %v3115_v8, 5 }
  0x2d   : > { %v411_v27 = vsel %vm3092_vm4, %v406_v16, %v410_v7  ;;  %v256_v28 = vrot.slane %v254_v18, 5  ;;  %v260_v29 = vrot.slane %v258_v21, 4  ;;  %v317_v31 = vshrl.u32 %v222_v15, 16  ;;  %v3159_v16 = vld [vmem:[%s3064_s11 + $0x5c] sm:$0x1] }
  0x2e   : > { %2437 = vmatmul.msk.bf16.vlgmr.msra.gmra.mxu2 %vm462_vm3, %v458_v22  ;;  %v451_v32 = vunpack.c.l.b16 %v411_v27  ;;  %v251_v33 = vor.u32 %v250_v23, %v247_v13  ;;  %v266_v34 = vrot.slane %v264_v24, 5  ;;  %v320_v37 = vshll.u32 %v222_v15, 16  ;;  %v3156_v15 = vld [vmem:[%s3064_s11 + $0x58] sm:$0xf]  ;;  %v218_v23 = vld [vmem:[%s3064_s11 + $0xc] sm:$0xf] }
  0x2f   : > { %v261_v39 = vor.u32 %v260_v29, %v256_v28  ;;  %v319_v40 = vrot.slane %v317_v31, 4  ;;  %v326_v41 = vshll.u32 %v3126_v26, 16  ;;  %v330_v42 = vshrl.u32 %v3126_v26, 16 }
  0x30   : > { %v460_v43 = vpack.c.b16 %v451_v32, %v450_v17  ;;  %v252_v44 = vrot.slane %v251_v33, 4  ;;  %v322_v45 = vrot.slane %v320_v37, 5  ;;  %v336_v47 = vshll.u32 %v3131_v30, 16 }
  0x31   : > { %v262_v48 = vrot.slane %v261_v39, 4  ;;  %v328_v49 = vrot.slane %v326_v41, 5  ;;  %v332_v50 = vrot.slane %v330_v42, 4  ;;  %v365_v52 = vshrl.u32 %v226_v38, 16 }
  0x32   : > { %2439 = vmatmul.msk.bf16.vlgmr.msra.gmra.mxu3 %vm462_vm3, %v460_v43  ;;  %v257_v53 = vsel %vm3092_vm4, %v252_v44, %v256_v28  ;;  %v323_v54 = vor.u32 %v322_v45, %v319_v40  ;;  %v338_v55 = vrot.slane %v336_v47, 5  ;;  %v368_v57 = vshll.u32 %v226_v38, 16  ;;  %v3171_v40 = vld [vmem:[%s3064_s11 + $0x10] sm:$0xf]  ;;  %v3174_v47 = vld [vmem:[%s3064_s11 + $0x14] sm:$0x1] }
  0x33   : > { %v267_v59 = vsel %vm3092_vm4, %v262_v48, %v266_v34  ;;  %v438_v60 = vunpack.c.l.b16 %v257_v53  ;;  %v333_v61 = vor.u32 %v332_v50, %v328_v49  ;;  %v367_v62 = vrot.slane %v365_v52, 4 }
  0x34   : > { %v439_v63 = vunpack.c.l.b16 %v267_v59  ;;  %v324_v0 = vrot.slane %v323_v54, 4  ;;  %v370_v1 = vrot.slane %v368_v57, 5  ;;  %v374_v3 = vshll.u32 %v3139_v51, 16 }
  0x35   : > { %v334_v4 = vrot.slane %v333_v61, 4  ;;  %v378_v5 = vshrl.u32 %v3139_v51, 16  ;;  %v384_v6 = vshll.u32 %v3145_v56, 16  ;;  %v413_v7 = vshrl.u32 %v230_v58, 16 }
  0x36   : > { %v454_v9 = vpack.c.b16 %v439_v63, %v438_v60  ;;  %v329_v10 = vsel %vm3092_vm4, %v324_v0, %v328_v49  ;;  %v371_v13 = vor.u32 %v370_v1, %v367_v62  ;;  %v376_v14 = vrot.slane %v374_v3, 5  ;;  %v656_v1 = vld [vmem:[%s3064_s11] sm:$0xe] }
  0x37   : > { %v339_v17 = vsel %vm3092_vm4, %v334_v4, %v338_v55  ;;  %v444_v18 = vunpack.c.l.b16 %v329_v10  ;;  %v380_v21 = vrot.slane %v378_v5, 4  ;;  %v386_v22 = vrot.slane %v384_v6, 5 }
  0x38   : > { %2433 = vmatmul.msk.bf16.vlgmr.msra.gmra.mxu0 %vm462_vm3, %v454_v9  ;;  %v445_v24 = vunpack.c.l.b16 %v339_v17  ;;  %v372_v27 = vrot.slane %v371_v13, 4  ;;  %v415_v28 = vrot.slane %v413_v7, 4  ;;  %v416_v29 = vshll.u32 %v230_v58, 16  ;;  %v2633_v7 = vld [vmem:[%s3889_s1 + $0xc] sm:$0x3] }
  0x39   : > { %v381_v31 = vor.u32 %v380_v21, %v376_v14  ;;  %v422_v32 = vshll.u32 %v3156_v15, 16  ;;  %v426_v33 = vshrl.u32 %v3156_v15, 16  ;;  %v432_v34 = vshll.u32 %v3159_v16, 16  ;;  %v2557_v9 = vld [vmem:[%s3064_s11 + $0xc] sm:$0xf] }
  0x3a   : > { %v457_v37 = vpack.c.b16 %v445_v24, %v444_v18  ;;  %v377_v38 = vsel %vm3092_vm4, %v372_v27, %v376_v14  ;;  %v418_v39 = vrot.slane %v416_v29, 5  ;;  %v269_v41 = vshrl.u32 %v218_v23, 16  ;;  %v3195_v27 = vld [vmem:[%s3064_s11 + $0x10] sm:$0xf] }
  0x3b   : > { %v382_v42 = vrot.slane %v381_v31, 4  ;;  %v448_v43 = vunpack.c.l.b16 %v377_v38  ;;  %v424_v44 = vrot.slane %v422_v32, 5  ;;  %v428_v45 = vrot.slane %v426_v33, 4 }
  0x3c   : > { %2436 = vmatmul.msk.bf16.gmra.mxu1 %vm462_vm3, %v457_v37  ;;  %v419_v48 = vor.u32 %v418_v39, %v415_v28  ;;  %v434_v49 = vrot.slane %v432_v34, 5  ;;  %v271_v50 = vrot.slane %v269_v41, 4  ;;  %v272_v52 = vshll.u32 %v218_v23, 16  ;;  %v3205_v37 = vld [vmem:[%s3064_s11 + $0x14] sm:$0x1] }
  0x3d   : > { %v387_v53 = vsel %vm3092_vm4, %v382_v42, %v386_v22  ;;  %v429_v54 = vor.u32 %v428_v45, %v424_v44  ;;  %v278_v55 = vshll.u32 %v3171_v40, 16  ;;  %v282_v57 = vshrl.u32 %v3171_v40, 16  ;;  %v2698_v41 = vld [vmem:[%s3889_s1 + $0xe] sm:$0x3]  ;;  %v2606_v45 = vld [vmem:[%s3889_s1 + $0xa] sm:$0x3] }
  0x3e   : > { %v449_v58 = vunpack.c.l.b16 %v387_v53  ;;  %v420_v59 = vrot.slane %v419_v48, 4  ;;  %v274_v60 = vrot.slane %v272_v52, 5  ;;  %v288_v61 = vshll.u32 %v3174_v47, 16  ;;  %v2723_v53 = vld [vmem:[%s3889_s1 + $0x10] sm:$0x3] }
  0x3f   : > { %v430_v62 = vrot.slane %v429_v54, 4  ;;  %v280_v63 = vrot.slane %v278_v55, 5  ;;  %v284_v0 = vrot.slane %v282_v57, 4  ;;  %v2481_v21 = vrot.slane %v656_v1, 9  ;;  %v2740_v55 = vld [vmem:[%s3064_s11] sm:$0xff] }
  0x40   : > { %v459_v3 = vpack.c.b16 %v449_v58, %v448_v43  ;;  %v425_v4 = vsel %vm3092_vm4, %v420_v59, %v424_v44  ;;  %v275_v5 = vor.u32 %v274_v60, %v271_v50  ;;  %v290_v6 = vrot.slane %v288_v61, 5 }
  0x41   : > { %v435_v10 = vsel %vm3092_vm4, %v430_v62, %v434_v49  ;;  %v452_v13 = vunpack.c.l.b16 %v425_v4  ;;  %v285_v14 = vor.u32 %v284_v0, %v280_v63  ;;  %v685_v22 = vrot.slane %v3110_v2, 5  ;;  %v3236_v4 = vld [vmem:[%s3064_s11 + $0x1c] sm:$0xf] }
  0x42   : > { %2438 = vmatmul.msk.bf16.gmra.mxu2 %vm462_vm3, %v459_v3  ;;  %v453_v17 = vunpack.c.l.b16 %v435_v10  ;;  %v276_v18 = vrot.slane %v275_v5, 4  ;;  %v1638_v24 = vsel %vm487_vm0, %v2633_v7, 0  ;;  %v1036_v28 = vshrl.u32 %v2557_v9, 16  ;;  %v2560_v3 = vld [vmem:[%s3064_s11 + $0x18] sm:$0xf] }
  0x43   : > { %v286_v23 = vrot.slane %v285_v14, 4  ;;  %v1039_v29 = vshll.u32 %v2557_v9, 16  ;;  %v687_v34 = vrot.slane %v685_v22, 4  ;;  %1647 = vmatpush.bf16.msra.mxu2 %v1638_v24  ;;  %v1045_v44 = vshll.u32 %v3195_v27, 16  ;;  %v658_v5 = vld [vmem:[%s3064_s11 + $0x18] sm:$0xe] }
  0x44   : > { %v461_v31 = vpack.c.b16 %v453_v17, %v452_v13  ;;  %v281_v32 = vsel %vm3092_vm4, %v276_v18, %v280_v63  ;;  %v1038_v39 = vrot.slane %v1036_v28, 4  ;;  %v686_v48 = vsel %vm3200_vm7, %v2481_v21, %v685_v22  ;;  %v657_v7 = vld [vmem:[%s3064_s11 + $0xc] sm:$0xe] }
  0x45   : > { %v291_v2 = vsel %vm3092_vm4, %v286_v23, %v290_v6  ;;  %v440_v38 = vunpack.c.l.b16 %v281_v32  ;;  %v1041_v43 = vrot.slane %v1039_v29, 5  ;;  %v689_v49 = vsel %vm3200_vm7, %v687_v34, %v688_v25  ;;  %v2748_v34 = vld [vmem:[%s3064_s11 + $0xc] sm:$0xff] }
  0x46   : > { %2440 = vmatmul.msk.bf16.gmra.mxu3 %vm462_vm3, %v461_v31  ;;  %v441_v42 = vunpack.c.l.b16 %v291_v2  ;;  %v1049_v50 = vshrl.u32 %v3195_v27, 16  ;;  %v1055_v52 = vshll.u32 %v3205_v37, 16  ;;  %v1047_v58 = vrot.slane %v1045_v44, 5 }
  0x47   : > { %v1042_v57 = vor.u32 %v1041_v43, %v1038_v39  ;;  %v1972_v59 = vsel %vm487_vm0, %v2698_v41, 0  ;;  %v1484_v25 = vsel %vm487_vm0, %v2606_v45, 0  ;;  %v741_v60 = vunpack.c.l.b16 %v686_v48 }
  0x48   : > { %v455_v54 = vpack.c.b16 %v441_v42, %v440_v38  ;;  %v1051_v8 = vrot.slane %v1049_v50, 4  ;;  %1981 = vmatpush.bf16.msra.mxu3 %v1972_v59  ;;  %v742_v61 = vunpack.c.l.b16 %v689_v49  ;;  %1493 = vmatpush.bf16.msra.mxu1 %v1484_v25  ;;  %v2178_v63 = vsel %vm487_vm0, %v2723_v53, 0 }
  0x49   : > { %v1043_v62 = vrot.slane %v1042_v57, 4  ;;  %v1057_v1 = vrot.slane %v1055_v52, 5  ;;  %2187 = vmatpush.bf16.msra.mxu0 %v2178_v63  ;;  %v692_v9 = vrot.slane %v3171_v40, 5  ;;  %v1060_v14 = vshrl.u32 %v2560_v3, 16  ;;  %v659_v63 = vld [vmem:[%s3064_s11 + $0x24] sm:$0xe] }
  0x4a   : > { %2434 = vmatmul.msk.bf16.gmra.mxu0 %vm462_vm3, %v455_v54  ;;  %v1052_v0 = vor.u32 %v1051_v8, %v1047_v58  ;;  %v757_v10 = vpack.c.b16 %v742_v61, %v741_v60  ;;  %v1063_v17 = vshll.u32 %v2560_v3, 16  ;;  %v1069_v21 = vshll.u32 %v3236_v4, 16  ;;  %v2563_v61 = vld [vmem:[%s3064_s11 + $0x24] sm:$0xf] }
  0x4b   : > { %v1048_v13 = vsel %vm3092_vm4, %v1043_v62, %v1047_v58  ;;  %v1073_v22 = vshrl.u32 %v3236_v4, 16  ;;  %v2483_v23 = vrot.slane %v658_v5, 9  ;;  %v2482_v24 = vrot.slane %v657_v7, 9  ;;  %v3270_v62 = vld [vmem:[%s3064_s11 + $0x28] sm:$0xf] }
  0x4c   : > { %2473 = vmatmul.msk.bf16.vlgmr.msrb.gmra.mxu1 %vm462_vm3, %v2740_v55  ;;  %v1053_v6 = vrot.slane %v1052_v0, 4  ;;  %v699_v28 = vrot.slane %v3068_v11, 5  ;;  %v1229_v40 = vunpack.c.l.b16 %v1048_v13  ;;  %v694_v29 = vrot.slane %v692_v9, 4  ;;  %v3255_v11 = vld [vmem:[%s3064_s11 + $0x20] sm:$0x1]  ;;  %v2741_v55 = vld [vmem:[%s3064_s11 + $0xc] sm:$0xff] }
  0x4d   : > { %v695_v31 = vrot.slane %v3174_v47, 5  ;;  %v702_v32 = vrot.slane %v3071_v12, 5  ;;  %v1062_v38 = vrot.slane %v1060_v14, 4  ;;  %v1065_v39 = vrot.slane %v1063_v17, 5 }
  0x4e   : > { %v1058_v18 = vsel %vm3092_vm4, %v1053_v6, %v1057_v1  ;;  %v700_v41 = vsel %vm3200_vm7, %v2483_v23, %v699_v28  ;;  %v1071_v42 = vrot.slane %v1069_v21, 5  ;;  %v1075_v43 = vrot.slane %v1073_v22, 4  ;;  %v2749_v22 = vld [vmem:[%s3064_s11 + $0x18] sm:$0xff] }
  0x4f   : > { %v1230_v2 = vunpack.c.l.b16 %v1058_v18  ;;  %v701_v44 = vrot.slane %v699_v28, 4  ;;  %v745_v45 = vunpack.c.l.b16 %v700_v41  ;;  %v693_v47 = vsel %vm3200_vm7, %v2482_v24, %v692_v9 }
  0x50   : > { %v696_v49 = vsel %vm3200_vm7, %v694_v29, %v695_v31  ;;  %v1066_v50 = vor.u32 %v1065_v39, %v1062_v38  ;;  %v1076_v53 = vor.u32 %v1075_v43, %v1071_v42  ;;  %v1079_v54 = vshll.u32 %v3255_v11, 16  ;;  %v2566_v43 = vld [vmem:[%s3064_s11 + $0x30] sm:$0xf] }
  0x51   : > { %v703_v12 = vsel %vm3200_vm7, %v701_v44, %v702_v32  ;;  %v1245_v48 = vpack.c.b16 %v1230_v2, %v1229_v40  ;;  %v743_v58 = vunpack.c.l.b16 %v693_v47  ;;  %v744_v59 = vunpack.c.l.b16 %v696_v49  ;;  %v3296_v44 = vld [vmem:[%s3064_s11 + $0x34] sm:$0xf] }
  0x52   : > { %2490 = vmatmul.msk.bf16.vlgmr.msrb.gmra.mxu2 %vm462_vm3, %v757_v10  ;;  %v746_v52 = vunpack.c.l.b16 %v703_v12  ;;  %v1067_v8 = vrot.slane %v1066_v50, 4  ;;  %v1077_v25 = vrot.slane %v1076_v53, 4  ;;  %v1081_v60 = vrot.slane %v1079_v54, 5 }
  0x53   : > { %v706_v0 = vrot.slane %v3126_v26, 5  ;;  %v709_v1 = vrot.slane %v3131_v30, 5  ;;  %v758_v3 = vpack.c.b16 %v744_v59, %v743_v58  ;;  %v2484_v5 = vrot.slane %v659_v63, 9  ;;  %v3308_v63 = vld [vmem:[%s3064_s11 + $0x38] sm:$0x1] }
  0x54   : > { %v759_v57 = vpack.c.b16 %v746_v52, %v745_v45  ;;  %v1072_v6 = vsel %vm3092_vm4, %v1067_v8, %v1071_v42  ;;  %v1084_v7 = vshrl.u32 %v2563_v61, 16  ;;  %v1087_v9 = vshll.u32 %v2563_v61, 16  ;;  %v2742_v42 = vld [vmem:[%s3064_s11 + $0x18] sm:$0xff] }
  0x55   : > { %v708_v10 = vrot.slane %v706_v0, 4  ;;  %v1082_v13 = vsel %vm3092_vm4, %v1077_v25, %v1081_v60  ;;  %v1093_v14 = vshll.u32 %v3270_v62, 16  ;;  %v1097_v17 = vshrl.u32 %v3270_v62, 16  ;;  %v2750_v25 = vld [vmem:[%s3064_s11 + $0x24] sm:$0xff] }
  0x56   : > { %2549 = vmatmul.msk.bf16.vlgmr.msrb.gmra.mxu3 %vm462_vm3, %v2748_v34  ;;  %v707_v26 = vsel %vm3200_vm7, %v2484_v5, %v706_v0  ;;  %v1231_v23 = vunpack.c.l.b16 %v1072_v6  ;;  %v1232_v24 = vunpack.c.l.b16 %v1082_v13  ;;  %v1086_v28 = vrot.slane %v1084_v7, 4  ;;  %v3288_v34 = vld [vmem:[%s3064_s11 + $0x2c] sm:$0x1]  ;;  %v2743_v6 = vld [vmem:[%s3064_s11 + $0x24] sm:$0xff]  ;;  %v3316_v13 = vld [vmem:[%s3064_s11 + $0x40] sm:$0xf] }
  0x57   : > { %v710_v30 = vsel %vm3200_vm7, %v708_v10, %v709_v1  ;;  %v747_v18 = vunpack.c.l.b16 %v707_v26  ;;  %v1089_v40 = vrot.slane %v1087_v9, 5  ;;  %v1095_v29 = vrot.slane %v1093_v14, 5  ;;  %v660_v26 = vld [vmem:[%s3064_s11 + $0x30] sm:$0xe] }
  0x58   : > { %v748_v21 = vunpack.c.l.b16 %v710_v30  ;;  %v1099_v31 = vrot.slane %v1097_v17, 4  ;;  %v1246_v2 = vpack.c.b16 %v1232_v24, %v1231_v23  ;;  %v1103_v41 = vshll.u32 %v3288_v34, 16 }
  0x59   : > { %v1090_v38 = vor.u32 %v1089_v40, %v1086_v28  ;;  %v1111_v49 = vshll.u32 %v2566_v43, 16  ;;  %v1117_v50 = vshll.u32 %v3296_v44, 16  ;;  %v1121_v52 = vshrl.u32 %v3296_v44, 16 }
  0x5a   : > { %2582 = vmatmul.msk.bf16.vlgmr.msrb.gmra.mxu0 %vm462_vm3, %v1245_v48  ;;  %v760_v32 = vpack.c.b16 %v748_v21, %v747_v18  ;;  %v1100_v39 = vor.u32 %v1099_v31, %v1095_v29  ;;  %v1105_v12 = vrot.slane %v1103_v41, 5  ;;  %v1108_v48 = vshrl.u32 %v2566_v43, 16  ;;  %v3331_v43 = vld [vmem:[%s3064_s11 + $0x44] sm:$0x1] }
  0x5b   : > { %v1091_v45 = vrot.slane %v1090_v38, 4  ;;  %v1113_v58 = vrot.slane %v1111_v49, 5  ;;  %v1119_v59 = vrot.slane %v1117_v50, 5  ;;  %v1123_v8 = vrot.slane %v1121_v52, 4  ;;  %v2744_v49 = vld [vmem:[%s3064_s11 + $0x30] sm:$0xff] }
  0x5c   : > { %2474 = vmatmul.msk.bf16.gmra.mxu1 %vm462_vm3, %v2741_v55  ;;  %v1101_v47 = vrot.slane %v1100_v39, 4  ;;  %v1110_v55 = vrot.slane %v1108_v48, 4  ;;  %v1141_v21 = vshll.u32 %v3316_v13, 16  ;;  %v713_v23 = vrot.slane %v3078_v19, 5 }
  0x5d   : > { %v1096_v53 = vsel %vm3092_vm4, %v1091_v45, %v1095_v29  ;;  %v1124_v1 = vor.u32 %v1123_v8, %v1119_v59  ;;  %v2485_v40 = vrot.slane %v660_v26, 9  ;;  %v2751_v29 = vld [vmem:[%s3064_s11 + $0x30] sm:$0xff] }
  0x5e   : > { %v1106_v54 = vsel %vm3092_vm4, %v1101_v47, %v1105_v12  ;;  %v1233_v60 = vunpack.c.l.b16 %v1096_v53  ;;  %v1114_v0 = vor.u32 %v1113_v58, %v1110_v55  ;;  %v1143_v38 = vrot.slane %v1141_v21, 5  ;;  %v2572_v55 = vld [vmem:[%s3064_s11 + $0x48] sm:$0xf]  ;;  %v3344_v58 = vld [vmem:[%s3064_s11 + $0x4c] sm:$0xf] }
  0x5f   : > { %v1234_v61 = vunpack.c.l.b16 %v1106_v54  ;;  %v1125_v9 = vrot.slane %v1124_v1, 4  ;;  %v715_v41 = vrot.slane %v713_v23, 4  ;;  %v714_v19 = vsel %vm3200_vm7, %v2485_v40, %v713_v23  ;;  %v2745_v40 = vld [vmem:[%s3064_s11 + $0x3c] sm:$0xff] }
  0x60   : > { %v1115_v7 = vrot.slane %v1114_v0, 4  ;;  %v1151_v12 = vshll.u32 %v3331_v43, 16  ;;  %v1156_v0 = vshrl.u32 %v2572_v55, 16  ;;  %v1159_v1 = vshll.u32 %v2572_v55, 16 }
  0x61   : > { %v1247_v5 = vpack.c.b16 %v1234_v61, %v1233_v60  ;;  %v720_v60 = vrot.slane %v3139_v51, 5  ;;  %v661_v61 = vld [vmem:[%s3064_s11 + $0x3c] sm:$0xe] }
  0x62   : > { %2491 = vmatmul.msk.bf16.gmra.mxu2 %vm462_vm3, %v758_v3  ;;  %v1127_v3 = vshll.u32 %v3308_v63, 16  ;;  %v1120_v14 = vsel %vm3092_vm4, %v1115_v7, %v1119_v59  ;;  %v1153_v54 = vrot.slane %v1151_v12, 5  ;;  %v2752_v7 = vld [vmem:[%s3064_s11 + $0x3c] sm:$0xff]  ;;  %v1161_v51 = vrot.slane %v1159_v1, 5 }
  0x63   : > { %v1235_v24 = vunpack.c.l.b16 %v1120_v14  ;;  %v723_v14 = vrot.slane %v3145_v56, 5  ;;  %v3385_v1 = vld [vmem:[%s3064_s11 + $0x5c] sm:$0x1] }
  0x64   : > { %v1129_v10 = vrot.slane %v1127_v3, 5  ;;  %v1165_v3 = vshll.u32 %v3344_v58, 16 }
  0x66   : > { %2550 = vmatmul.msk.bf16.gmra.mxu3 %vm462_vm3, %v2749_v22  ;;  %v1130_v17 = vsel %vm3092_vm4, %v1125_v9, %v1129_v10  ;;  %v1145_v22 = vshrl.u32 %v3316_v13, 16  ;;  %v2486_v10 = vrot.slane %v661_v61, 9  ;;  %v1167_v26 = vrot.slane %v1165_v3, 5 }
  0x67   : > { %v1236_v28 = vunpack.c.l.b16 %v1130_v17  ;;  %v1158_v17 = vrot.slane %v1156_v0, 4  ;;  %v730_v61 = vrot.slane %v3097_v46, 5  ;;  %v1199_v46 = vshll.u32 %v3385_v1, 16 }
  0x68   : > { %v1147_v39 = vrot.slane %v1145_v22, 4  ;;  %v721_v22 = vsel %vm3200_vm7, %v2486_v10, %v720_v60  ;;  %v2746_v10 = vld [vmem:[%s3064_s11 + $0x48] sm:$0xff] }
  0x69   : > { %v1248_v45 = vpack.c.b16 %v1236_v28, %v1235_v24  ;;  %v1162_v24 = vor.u32 %v1161_v51, %v1158_v17 }
  0x6a   : > { %2583 = vmatmul.msk.bf16.gmra.mxu0 %vm462_vm3, %v1246_v2  ;;  %v1148_v47 = vor.u32 %v1147_v39, %v1143_v38 }
  0x6c   : > { %2475 = vmatmul.msk.bf16.gmra.mxu1 %vm462_vm3, %v2742_v42  ;;  %v716_v42 = vrot.slane %v3081_v20, 5  ;;  %v749_v20 = vunpack.c.l.b16 %v714_v19  ;;  %v1149_v53 = vrot.slane %v1148_v47, 4 }
  0x6e   : > { %v717_v48 = vsel %vm3200_vm7, %v715_v41, %v716_v42  ;;  %v3370_v42 = vld [vmem:[%s3064_s11 + $0x58] sm:$0xf] }
  0x6f   : > { %v750_v50 = vunpack.c.l.b16 %v717_v48  ;;  %v1189_v47 = vshll.u32 %v3370_v42, 16 }
  0x71   : > { %v761_v59 = vpack.c.b16 %v750_v50, %v749_v20  ;;  %v1193_v20 = vshrl.u32 %v3370_v42, 16  ;;  %v662_v50 = vld [vmem:[%s3064_s11 + $0x48] sm:$0xe] }
  0x72   : > { %2492 = vmatmul.msk.bf16.gmra.mxu2 %vm462_vm3, %v759_v57  ;;  %v2569_v57 = vld [vmem:[%s3064_s11 + $0x3c] sm:$0xf] }
  0x73   : > { %v1132_v30 = vshrl.u32 %v2569_v57, 16  ;;  %v1135_v18 = vshll.u32 %v2569_v57, 16  ;;  %v722_v57 = vrot.slane %v720_v60, 4  ;;  %v1195_v0 = vrot.slane %v1193_v20, 4 }
  0x75   : > { %v1134_v31 = vrot.slane %v1132_v30, 4  ;;  %v1137_v2 = vrot.slane %v1135_v18, 5  ;;  %v3358_v18 = vld [vmem:[%s3064_s11 + $0x50] sm:$0x1]  ;;  %v724_v23 = vsel %vm3200_vm7, %v722_v57, %v723_v14 }
  0x76   : > { %2551 = vmatmul.msk.bf16.gmra.mxu3 %vm462_vm3, %v2750_v25  ;;  %v1154_v25 = vsel %vm3092_vm4, %v1149_v53, %v1153_v54  ;;  %v1175_v56 = vshll.u32 %v3358_v18, 16  ;;  %v2753_v54 = vld [vmem:[%s3064_s11 + $0x48] sm:$0xff] }
  0x77   : > { %v1238_v9 = vunpack.c.l.b16 %v1154_v25  ;;  %v2487_v25 = vrot.slane %v662_v50, 9  ;;  %v3418_v50 = vld [vmem:[%s3064_s11 + $0x68] sm:$0x1] }
  0x78   : > { %v1177_v41 = vrot.slane %v1175_v56, 5 }
  0x7a   : > { %2584 = vmatmul.msk.bf16.gmra.mxu0 %vm462_vm3, %v1247_v5  ;;  %v1169_v5 = vshrl.u32 %v3344_v58, 16 }
  0x7c   : > { %2476 = vmatmul.msk.bf16.gmra.mxu1 %vm462_vm3, %v2743_v6  ;;  %v1171_v30 = vrot.slane %v1169_v5, 4 }
  0x7e   : > { %v1172_v28 = vor.u32 %v1171_v30, %v1167_v26  ;;  %v2578_v30 = vld [vmem:[%s3064_s11 + $0x60] sm:$0xf] }
  0x80   : > { %v1173_v39 = vrot.slane %v1172_v28, 4  ;;  %v1207_v28 = vshll.u32 %v2578_v30, 16 }
  0x82   : > { %2493 = vmatmul.msk.bf16.gmra.mxu2 %vm462_vm3, %v760_v32  ;;  %v1138_v32 = vor.u32 %v1137_v2, %v1134_v31  ;;  %v752_v31 = vunpack.c.l.b16 %v724_v23  ;;  %v2575_v2 = vld [vmem:[%s3064_s11 + $0x54] sm:$0xf]  ;;  %v1178_v48 = vsel %vm3092_vm4, %v1173_v39, %v1177_v41 }
  0x83   : > { %v1183_v19 = vshll.u32 %v2575_v2, 16 }
  0x84   : > { %v1139_v52 = vrot.slane %v1138_v32, 4 }
  0x85   : > { %v1185_v53 = vrot.slane %v1183_v19, 5 }
  0x86   : > { %2552 = vmatmul.msk.bf16.gmra.mxu3 %vm462_vm3, %v2751_v29  ;;  %v1144_v8 = vsel %vm3092_vm4, %v1139_v52, %v1143_v38  ;;  %v751_v29 = vunpack.c.l.b16 %v721_v22  ;;  %v1163_v38 = vrot.slane %v1162_v24, 4  ;;  %v1204_v24 = vshrl.u32 %v2578_v30, 16 }
  0x87   : > { %v1237_v6 = vunpack.c.l.b16 %v1144_v8  ;;  %v1191_v8 = vrot.slane %v1189_v47, 5  ;;  %v1209_v47 = vrot.slane %v1207_v28, 5 }
  0x88   : > { %v762_v32 = vpack.c.b16 %v752_v31, %v751_v29  ;;  %v1168_v12 = vsel %vm3092_vm4, %v1163_v38, %v1167_v26  ;;  %v1201_v26 = vrot.slane %v1199_v46, 5  ;;  %v734_v31 = vrot.slane %v3156_v15, 5  ;;  %v663_v38 = vld [vmem:[%s3064_s11 + $0x54] sm:$0xe] }
  0x89   : > { %v1249_v21 = vpack.c.b16 %v1238_v9, %v1237_v6  ;;  %v1239_v55 = vunpack.c.l.b16 %v1168_v12  ;;  %v1196_v9 = vor.u32 %v1195_v0, %v1191_v8  ;;  %v737_v15 = vrot.slane %v3159_v16, 5  ;;  %v2747_v0 = vld [vmem:[%s3064_s11 + $0x54] sm:$0xff] }
  0x8a   : > { %2585 = vmatmul.msk.bf16.gmra.mxu0 %vm462_vm3, %v1248_v45  ;;  %v1180_v45 = vshrl.u32 %v2575_v2, 16 }
  0x8b   : > { %v1197_v51 = vrot.slane %v1196_v9, 4 }
  0x8c   : > { %2477 = vmatmul.msk.bf16.gmra.mxu1 %vm462_vm3, %v2744_v49  ;;  %v727_v49 = vrot.slane %v3088_v35, 5  ;;  %v1182_v52 = vrot.slane %v1180_v45, 4  ;;  %v2754_v45 = vld [vmem:[%s3064_s11 + $0x54] sm:$0xff] }
  0x8e   : > { %v729_v60 = vrot.slane %v727_v49, 4  ;;  %v1186_v35 = vor.u32 %v1185_v53, %v1182_v52  ;;  %v728_v6 = vsel %vm3200_vm7, %v2487_v25, %v727_v49  ;;  %v736_v49 = vrot.slane %v734_v31, 4 }
  0x8f   : > { %v753_v14 = vunpack.c.l.b16 %v728_v6 }
  0x90   : > { %v1187_v57 = vrot.slane %v1186_v35, 4  ;;  %v738_v25 = vsel %vm3200_vm7, %v736_v49, %v737_v15  ;;  %v2755_v49 = vld [vmem:[%s3064_s11 + $0x60] sm:$0xff] }
  0x91   : > { %v756_v46 = vunpack.c.l.b16 %v738_v25 }
  0x92   : > { %2494 = vmatmul.msk.bf16.gmra.mxu2 %vm462_vm3, %v761_v59  ;;  %v1240_v59 = vunpack.c.l.b16 %v1178_v48  ;;  %v1192_v22 = vsel %vm3092_vm4, %v1187_v57, %v1191_v8  ;;  %v2488_v48 = vrot.slane %v663_v38, 9 }
  0x93   : > { %v1241_v39 = vunpack.c.l.b16 %v1192_v22  ;;  %v1382_v22 = vrot.slane %v3205_v37, 5 }
  0x94   : > { %v1250_v3 = vpack.c.b16 %v1240_v59, %v1239_v55  ;;  %v2674_v59 = vld [vmem:[%s3064_s11 + $0x18] sm:$0xf]  ;;  %v735_v8 = vsel %vm3200_vm7, %v2488_v48, %v734_v31 }
  0x95   : > { %v1730_v6 = vshrl.u32 %v2674_v59, 16  ;;  %v755_v9 = vunpack.c.l.b16 %v735_v8 }
  0x96   : > { %2553 = vmatmul.msk.bf16.gmra.mxu3 %vm462_vm3, %v2752_v7  ;;  %v731_v7 = vsel %vm3200_vm7, %v729_v60, %v730_v61  ;;  %v1223_v60 = vshll.u32 %v3418_v50, 16  ;;  %v3432_v61 = vld [vmem:[%s3064_s11 + $0x1c] sm:$0xf] }
  0x97   : > { %v754_v17 = vunpack.c.l.b16 %v731_v7  ;;  %v1733_v7 = vshll.u32 %v2674_v59, 16  ;;  %v1739_v57 = vshll.u32 %v3432_v61, 16  ;;  %v1732_v28 = vrot.slane %v1730_v6, 4 }
  0x98   : > { %v1225_v30 = vrot.slane %v1223_v60, 5  ;;  %v2073_v6 = vrot.slane %v3432_v61, 5 }
  0x99   : > { %v763_v23 = vpack.c.b16 %v754_v17, %v753_v14  ;;  %v1743_v14 = vshrl.u32 %v3432_v61, 16  ;;  %v1741_v31 = vrot.slane %v1739_v57, 5 }
  0x9a   : > { %2586 = vmatmul.msk.bf16.gmra.mxu0 %vm462_vm3, %v1249_v21  ;;  %v3399_v21 = vld [vmem:[%s3064_s11 + $0x64] sm:$0xf] }
  0x9b   : > { %v1213_v56 = vshll.u32 %v3399_v21, 16  ;;  %v1217_v2 = vshrl.u32 %v3399_v21, 16 }
  0x9c   : > { %2478 = vmatmul.msk.bf16.gmra.mxu1 %vm462_vm3, %v2745_v40  ;;  %v1202_v40 = vsel %vm3092_vm4, %v1197_v51, %v1201_v26 }
  0x9d   : > { %v1242_v19 = vunpack.c.l.b16 %v1202_v40  ;;  %v1215_v12 = vrot.slane %v1213_v56, 5  ;;  %v1219_v20 = vrot.slane %v1217_v2, 4  ;;  %v1735_v56 = vrot.slane %v1733_v7, 5 }
  0x9e   : > { %v764_v40 = vpack.c.b16 %v756_v46, %v755_v9  ;;  %v1745_v2 = vrot.slane %v1743_v14, 4  ;;  %v2677_v46 = vld [vmem:[%s3064_s11 + $0x24] sm:$0xf] }
  0x9f   : > { %v1220_v16 = vor.u32 %v1219_v20, %v1215_v12  ;;  %v1736_v48 = vor.u32 %v1735_v56, %v1732_v28  ;;  %v2591_v28 = vld [vmem:[%s3064_s11 + $0x18] sm:$0xe]  ;;  %v1754_v56 = vshrl.u32 %v2677_v46, 16 }
  0xa0   : > { %v1746_v20 = vor.u32 %v1745_v2, %v1741_v31 }
  0xa1   : > { %v1221_v26 = vrot.slane %v1220_v16, 4  ;;  %v1737_v25 = vrot.slane %v1736_v48, 4 }
  0xa2   : > { %2495 = vmatmul.msk.bf16.gmra.mxu2 %vm462_vm3, %v762_v32  ;;  %v1206_v32 = vrot.slane %v1204_v24, 4  ;;  %v1747_v60 = vrot.slane %v1746_v20, 4 }
  0xa3   : > { %v1226_v37 = vsel %vm3092_vm4, %v1221_v26, %v1225_v30  ;;  %v1386_v30 = vrot.slane %v3236_v4, 5 }
  0xa4   : > { %v1210_v55 = vor.u32 %v1209_v47, %v1206_v32 }
  0xa6   : > { %2554 = vmatmul.msk.bf16.gmra.mxu3 %vm462_vm3, %v2753_v54  ;;  %v1251_v54 = vpack.c.b16 %v1242_v19, %v1241_v39  ;;  %v1211_v51 = vrot.slane %v1210_v55, 4 }
  0xa7   : > { %v3388_v5 = vpop.f32.mrf.mxu1 }
  0xa8   : > { %v1216_v39 = vsel %vm3092_vm4, %v1211_v51, %v1215_v12  ;;  %v1244_v12 = vunpack.c.l.b16 %v1226_v37  ;;  %v1742_v51 = vsel %vm3092_vm4, %v1737_v25, %v1741_v31  ;;  %v1388_v37 = vrot.slane %v1386_v30, 4 }
  0xa9   : > { %v1243_v15 = vunpack.c.l.b16 %v1216_v39  ;;  %v2599_v39 = vrot.slane %v2591_v28, 9 }
  0xaa   : > { %2587 = vmatmul.msk.bf16.gmra.mxu0 %vm462_vm3, %v1250_v3  ;;  %v1379_v3 = vrot.slane %v3195_v27, 5 }
  0xab   : > { %v1252_v16 = vpack.c.b16 %v1244_v12, %v1243_v15  ;;  %v1756_v12 = vrot.slane %v1754_v56, 4 }
  0xac   : > { %2479 = vmatmul.msk.bf16.gmra.mxu1 %vm462_vm3, %v2746_v10  ;;  %v2590_v10 = vld [vmem:[%s3064_s11 + $0xc] sm:$0xe]  ;;  %v1381_v24 = vrot.slane %v1379_v3, 4 }
  0xae   : > { %v1383_v47 = vsel %vm3200_vm7, %v1381_v24, %v1382_v22 }
  0xaf   : > { %v3407_v29 = vpop.f32.mrf.mxu1  ;;  %v1436_v59 = vunpack.c.l.b16 %v1383_v47  ;;  %v1923_v47 = vunpack.c.l.b16 %v1742_v51 }
  0xb1   : > { %v3412_v41 = vpop.f32.mrf.mxu2 }
  0xb2   : > { %2496 = vmatmul.msk.bf16.gmra.mxu2 %vm462_vm3, %v763_v23  ;;  %v2598_v23 = vrot.slane %v2590_v10, 9  ;;  %v3472_v10 = vld [vmem:[%s3064_s11 + $0x28] sm:$0xf] }
  0xb3   : > { %v1763_v2 = vshll.u32 %v3472_v10, 16  ;;  %v1767_v31 = vshrl.u32 %v3472_v10, 16 }
  0xb4   : > { %v1380_v32 = vsel %vm3200_vm7, %v2598_v23, %v1379_v3  ;;  %v2707_v3 = vld [vmem:[%s3064_s11 + $0x18] sm:$0xe]  ;;  %v2075_v23 = vrot.slane %v2073_v6, 4 }
  0xb5   : > { %v3420_v52 = vpop.f32.mrf.mxu0  ;;  %v3422_v53 = vpop.f32.mrf.mxu3  ;;  %v1435_v55 = vunpack.c.l.b16 %v1380_v32  ;;  %v2715_v26 = vrot.slane %v2707_v3, 9  ;;  %v2756_v32 = vld [vmem:[%s3064_s11 + $0x18] sm:$0xff] }
  0xb6   : > { %2555 = vmatmul.msk.bf16.gmra.mxu3 %vm462_vm3, %v2754_v45  ;;  %v2676_v45 = vld [vmem:[%s3064_s11 + $0x20] sm:$0x1] }
  0xb7   : > { %v1451_v9 = vpack.c.b16 %v1436_v59, %v1435_v55  ;;  %v2076_v24 = vrot.slane %v2676_v45, 5  ;;  %v1769_v55 = vrot.slane %v1767_v31, 4  ;;  %v3498_v59 = vld [vmem:[%s3064_s11 + $0x2c] sm:$0x1] }
  0xb8   : > { %v1773_v51 = vshll.u32 %v3498_v59, 16 }
  0xb9   : > { %v3435_v35 = vpop.f32.mrf.mxu1  ;;  %v3442_v17 = vpop.f32.mrf.mxu2 }
  0xba   : > { %2588 = vmatmul.msk.bf16.gmra.mxu0 %vm462_vm3, %v1251_v54  ;;  %v1749_v54 = vshll.u32 %v2676_v45, 16  ;;  %v2074_v45 = vsel %vm3200_vm7, %v2715_v26, %v2073_v6 }
  0xbb   : > { %v2129_v3 = vunpack.c.l.b16 %v2074_v45 }
  0xbc   : > { %2480 = vmatmul.msk.bf16.gmra.mxu1 %vm462_vm3, %v2747_v0  ;;  %v1751_v0 = vrot.slane %v1749_v54, 5  ;;  %v1765_v54 = vrot.slane %v1763_v2, 5 }
  0xbd   : > { %v3446_v27 = vpop.f32.mrf.mxu0  ;;  %v3448_v38 = vpop.f32.mrf.mxu3 }
  0xbe   : > { %v1752_v22 = vsel %vm3092_vm4, %v1747_v60, %v1751_v0 }
  0xbf   : > { %v1924_v48 = vunpack.c.l.b16 %v1752_v22 }
  0xc1   : > { %v3455_v19 = vpop.f32.mrf.mxu1  ;;  %v1939_v0 = vpack.c.b16 %v1924_v48, %v1923_v47 }
  0xc2   : > { %2497 = vmatmul.msk.bf16.gmra.mxu2 %vm462_vm3, %v764_v40  ;;  %v1757_v40 = vshll.u32 %v2677_v46, 16 }
  0xc4   : > { %v1759_v20 = vrot.slane %v1757_v40, 5  ;;  %v3513_v40 = vld [vmem:[%s3064_s11 + $0x34] sm:$0xf] }
  0xc5   : > { %v3463_v8 = vpop.f32.mrf.mxu2 }
  0xc6   : > { %2556 = vmatmul.msk.bf16.gmra.mxu3 %vm462_vm3, %v2755_v49  ;;  %v2077_v49 = vsel %vm3200_vm7, %v2075_v23, %v2076_v24  ;;  %v1760_v46 = vor.u32 %v1759_v20, %v1756_v12  ;;  %v2708_v24 = vld [vmem:[%s3064_s11 + $0x24] sm:$0xe]  ;;  %v1393_v12 = vrot.slane %v3270_v62, 5  ;;  %v1787_v20 = vshll.u32 %v3513_v40, 16 }
  0xc7   : > { %v3468_v7 = vpop.f32.mrf.mxu0  ;;  %v2130_v6 = vunpack.c.l.b16 %v2077_v49 }
  0xc8   : > { %v1761_v31 = vrot.slane %v1760_v46, 4 }
  0xc9   : > { %v3474_v57 = vpop.f32.mrf.mxu3  ;;  %v616_v14 = vpop.f32.mrf.mxu1  ;;  %v2145_v28 = vpack.c.b16 %v2130_v6, %v2129_v3  ;;  %v2083_v3 = vrot.slane %v3498_v59, 5 }
  0xca   : > { %2589 = vmatmul.msk.bf16.gmra.mxu0 %vm462_vm3, %v1252_v16  ;;  %v617_v61 = vadd.f32 %v616_v14, %v3420_v52  ;;  %v1389_v52 = vrot.slane %v3255_v11, 5  ;;  %v1387_v16 = vsel %vm3200_vm7, %v2599_v39, %v1386_v30  ;;  %v1770_v14 = vor.u32 %v1769_v55, %v1765_v54  ;;  %v2680_v30 = vld [vmem:[%s3064_s11 + $0x30] sm:$0xf] }
  0xcb   : > { %v1437_v26 = vunpack.c.l.b16 %v1387_v16  ;;  %v1778_v47 = vshrl.u32 %v2680_v30, 16  ;;  %v1781_v48 = vshll.u32 %v2680_v30, 16  ;;  %v1396_v55 = vrot.slane %v3288_v34, 5 }
  0xcc   : > { %2607 = vmatmul.msk.bf16.vlgmr.msra.gmra.mxu1 %vm462_vm3, %v1451_v9  ;;  %v1390_v60 = vsel %vm3200_vm7, %v1388_v37, %v1389_v52  ;;  %v1771_v39 = vrot.slane %v1770_v14, 4  ;;  %v2080_v37 = vrot.slane %v3472_v10, 5  ;;  %v2592_v10 = vld [vmem:[%s3064_s11 + $0x24] sm:$0xe] }
  0xcd   : > { %v3487_v4 = vpop.f32.mrf.mxu2  ;;  %v1438_v22 = vunpack.c.l.b16 %v1390_v60  ;;  %v1766_v60 = vsel %vm3092_vm4, %v1761_v31, %v1765_v54  ;;  %v1780_v6 = vrot.slane %v1778_v47, 4  ;;  %v1783_v46 = vrot.slane %v1781_v48, 5 }
  0xce   : > { %v2082_v62 = vrot.slane %v2080_v37, 4  ;;  %v1789_v54 = vrot.slane %v1787_v20, 5  ;;  %v1925_v30 = vunpack.c.l.b16 %v1766_v60 }
  0xcf   : > { %v3495_v15 = vpop.f32.mrf.mxu0  ;;  %v1452_v52 = vpack.c.b16 %v1438_v22, %v1437_v26  ;;  %v1395_v26 = vrot.slane %v1393_v12, 4 }
  0xd0   : > { %v2084_v31 = vsel %vm3200_vm7, %v2082_v62, %v2083_v3  ;;  %v2709_v3 = vld [vmem:[%s3064_s11 + $0x30] sm:$0xe] }
  0xd1   : > { %v3500_v25 = vpop.f32.mrf.mxu3  ;;  %v618_v11 = vpop.f32.mrf.mxu1 }
  0xd2   : > { %2666 = vmatmul.msk.bf16.vlgmr.msra.gmra.mxu2 %vm462_vm3, %v2756_v32  ;;  %v619_v9 = vadd.f32 %v618_v11, %v3446_v27  ;;  %v1775_v27 = vrot.slane %v1773_v51, 5  ;;  %v2716_v32 = vrot.slane %v2708_v24, 9  ;;  %v2600_v51 = vrot.slane %v2592_v10, 9  ;;  %v2757_v24 = vld [vmem:[%s3064_s11 + $0x24] sm:$0xff] }
  0xd4   : > { %v2081_v34 = vsel %vm3200_vm7, %v2716_v32, %v2080_v37  ;;  %v1397_v32 = vsel %vm3200_vm7, %v1395_v26, %v1396_v55 }
  0xd5   : > { %v801_v23 = vpop.f32.mrf.mxu2 }
  0xd6   : > { %2699 = vmatmul.msk.bf16.vlgmr.msra.gmra.mxu3 %vm462_vm3, %v1939_v0  ;;  %v841_v56 = vadd.f32 %v801_v23, %v617_v61  ;;  %v1791_v61 = vshrl.u32 %v3513_v40, 16  ;;  %v1776_v0 = vsel %vm3092_vm4, %v1771_v39, %v1775_v27  ;;  %v2131_v39 = vunpack.c.l.b16 %v2081_v34 }
  0xd7   : > { %v1289_v2 = vpop.f32.mrf.mxu0  ;;  %v1784_v27 = vor.u32 %v1783_v46, %v1780_v6  ;;  %v2087_v46 = vrot.slane %v3513_v40, 5 }
  0xd8   : > { %v1793_v22 = vrot.slane %v1791_v61, 4 }
  0xd9   : > { %v955_v45 = vpop.f32.mrf.mxu3  ;;  %v621_v49 = vpop.f32.mrf.mxu1 }
  0xda   : > { %2724 = vmatmul.msk.bf16.vlgmr.msra.gmra.mxu0 %vm462_vm3, %v2145_v28  ;;  %v995_v11 = vadd.f32 %v955_v45, %v841_v56  ;;  %v622_v16 = vadd.f32 %v621_v49, %v3468_v7  ;;  %v1926_v28 = vunpack.c.l.b16 %v1776_v0  ;;  %v3535_v56 = vld [vmem:[%s3064_s11 + $0x38] sm:$0x1]  ;;  %v2132_v49 = vunpack.c.l.b16 %v2084_v31 }
  0xdb   : > { %v1797_v47 = vshll.u32 %v3535_v56, 16 }
  0xdc   : > { %2608 = vmatmul.msk.bf16.gmra.mxu1 %vm462_vm3, %v1452_v52  ;;  %v3531_v7 = vadd.f32 %v1289_v2, %v995_v11  ;;  %v1394_v52 = vsel %vm3200_vm7, %v2600_v51, %v1393_v12  ;;  %v1940_v45 = vpack.c.b16 %v1926_v28, %v1925_v30  ;;  %v1440_v11 = vunpack.c.l.b16 %v1397_v32  ;;  %v3553_v51 = vld [vmem:[%s3064_s11 + $0x40] sm:$0xf] }
  0xdd   : > { %v803_v14 = vpop.f32.mrf.mxu2  ;;  %v1439_v61 = vunpack.c.l.b16 %v1394_v52  ;;  %v1785_v12 = vrot.slane %v1784_v27, 4  ;;  %v1799_v0 = vrot.slane %v1797_v47, 5  ;;  %v2146_v55 = vpack.c.b16 %v2132_v49, %v2131_v39  ;;  %v2758_v49 = vld [vmem:[%s3064_s11 + $0x30] sm:$0xff] }
  0xde   : > { %v842_v23 = vadd.f32 %v803_v14, %v619_v9  ;;  %v1794_v9 = vor.u32 %v1793_v22, %v1789_v54  ;;  %v2683_v14 = vld [vmem:[%s3064_s11 + $0x3c] sm:$0xf]  ;;  %v1400_v30 = vrot.slane %v3296_v44, 5  ;;  %v2089_v27 = vrot.slane %v2087_v46, 4 }
  0xdf   : > { %v1291_v59 = vpop.f32.mrf.mxu0  ;;  %v1802_v31 = vshrl.u32 %v2683_v14, 16  ;;  %v1805_v39 = vshll.u32 %v2683_v14, 16  ;;  %v1403_v52 = vrot.slane %v3308_v63, 5 }
  0xe0   : > { %v1795_v60 = vrot.slane %v1794_v9, 4 }
  0xe1   : > { %v957_v37 = vpop.f32.mrf.mxu3  ;;  %v623_v2 = vpop.f32.mrf.mxu1 }
  0xe2   : > { %v996_v48 = vadd.f32 %v957_v37, %v842_v23  ;;  %2667 = vmatmul.msk.bf16.gmra.mxu2 %vm462_vm3, %v2757_v24  ;;  %v624_v20 = vadd.f32 %v623_v2, %v3495_v15  ;;  %v1453_v15 = vpack.c.b16 %v1440_v11, %v1439_v61  ;;  %v1790_v23 = vsel %vm3092_vm4, %v1785_v12, %v1789_v54 }
  0xe3   : > { %v1800_v24 = vsel %vm3092_vm4, %v1795_v60, %v1799_v0  ;;  %v2090_v37 = vrot.slane %v3535_v56, 5  ;;  %v1811_v54 = vshll.u32 %v3553_v51, 16  ;;  %v1815_v2 = vshrl.u32 %v3553_v51, 16  ;;  %v2685_v0 = vld [vmem:[%s3064_s11 + $0x44] sm:$0x1] }
  0xe4   : > { %v3548_v34 = vadd.f32 %v1291_v59, %v996_v48  ;;  %v2593_v59 = vld [vmem:[%s3064_s11 + $0x30] sm:$0xe]  ;;  %v1928_v9 = vunpack.c.l.b16 %v1800_v24  ;;  %v1402_v48 = vrot.slane %v1400_v30, 4  ;;  %v1804_v61 = vrot.slane %v1802_v31, 4  ;;  %v2710_v31 = vld [vmem:[%s3064_s11 + $0x3c] sm:$0xe] }
  0xe5   : > { %v806_v10 = vpop.f32.mrf.mxu2  ;;  %v2601_v47 = vrot.slane %v2593_v59, 9  ;;  %v1807_v11 = vrot.slane %v1805_v39, 5  ;;  %v2091_v63 = vsel %vm3200_vm7, %v2089_v27, %v2090_v37  ;;  %v1813_v12 = vrot.slane %v1811_v54, 5 }
  0xe6   : > { %2700 = vmatmul.msk.bf16.gmra.mxu3 %vm462_vm3, %v1940_v45  ;;  %v843_v62 = vadd.f32 %v806_v10, %v622_v16  ;;  %v2717_v16 = vrot.slane %v2709_v3, 9  ;;  %v1817_v60 = vrot.slane %v1815_v2, 4  ;;  %v1821_v24 = vshll.u32 %v2685_v0, 16  ;;  %v3587_v2 = vld [vmem:[%s3064_s11 + $0x4c] sm:$0xf] }
  0xe7   : > { %v1294_v6 = vpop.f32.mrf.mxu0 }
  0xe8   : > { %v2088_v56 = vsel %vm3200_vm7, %v2717_v16, %v2087_v46  ;;  %v1404_v46 = vsel %vm3200_vm7, %v1402_v48, %v1403_v52  ;;  %v2094_v16 = vrot.slane %v3553_v51, 5  ;;  %v2097_v48 = vrot.slane %v2685_v0, 5 }
  0xe9   : > { %v960_v26 = vpop.f32.mrf.mxu3  ;;  %v626_v22 = vpop.f32.mrf.mxu1  ;;  %v2133_v3 = vunpack.c.l.b16 %v2088_v56  ;;  %v1442_v59 = vunpack.c.l.b16 %v1404_v46 }
  0xea   : > { %2725 = vmatmul.msk.bf16.gmra.mxu0 %vm462_vm3, %v2146_v55  ;;  %v997_v28 = vadd.f32 %v960_v26, %v843_v62  ;;  %v627_v40 = vadd.f32 %v626_v22, %v3388_v5  ;;  %v1927_v5 = vunpack.c.l.b16 %v1790_v23  ;;  %v1808_v22 = vor.u32 %v1807_v11, %v1804_v61 }
  0xeb   : > { %v1818_v23 = vor.u32 %v1817_v60, %v1813_v12  ;;  %v2096_v51 = vrot.slane %v2094_v16, 4  ;;  %v1407_v11 = vrot.slane %v3316_v13, 5 }
  0xec   : > { %2609 = vmatmul.msk.bf16.gmra.mxu1 %vm462_vm3, %v1453_v15  ;;  %v3568_v44 = vadd.f32 %v1294_v6, %v997_v28  ;;  %v1941_v62 = vpack.c.b16 %v1928_v9, %v1927_v5  ;;  %v2134_v15 = vunpack.c.l.b16 %v2091_v63  ;;  %v1809_v54 = vrot.slane %v1808_v22, 4 }
  0xed   : > { %v808_v32 = vpop.f32.mrf.mxu2  ;;  %v1823_v5 = vrot.slane %v1821_v24, 5  ;;  %v2718_v9 = vrot.slane %v2710_v31, 9  ;;  %v1839_v63 = vshrl.u32 %v3587_v2, 16  ;;  %v2759_v24 = vld [vmem:[%s3064_s11 + $0x3c] sm:$0xff]  ;;  %v3613_v31 = vld [vmem:[%s3064_s11 + $0x50] sm:$0x1] }
  0xee   : > { %v844_v45 = vadd.f32 %v808_v32, %v624_v20  ;;  %v1401_v20 = vsel %vm3200_vm7, %v2601_v47, %v1400_v30  ;;  %v2686_v30 = vld [vmem:[%s3064_s11 + $0x48] sm:$0xf]  ;;  %v2147_v27 = vpack.c.b16 %v2134_v15, %v2133_v3  ;;  %v1819_v32 = vrot.slane %v1818_v23, 4 }
  0xef   : > { %v1296_v10 = vpop.f32.mrf.mxu0  ;;  %v1441_v28 = vunpack.c.l.b16 %v1401_v20  ;;  %v1814_v0 = vsel %vm3092_vm4, %v1809_v54, %v1813_v12  ;;  %v2095_v13 = vsel %vm3200_vm7, %v2718_v9, %v2094_v16  ;;  %v1409_v15 = vrot.slane %v1407_v11, 4 }
  0xf0   : > { %v1824_v3 = vsel %vm3092_vm4, %v1819_v32, %v1823_v5  ;;  %v1841_v22 = vrot.slane %v1839_v63, 4 }
  0xf1   : > { %v962_v55 = vpop.f32.mrf.mxu3  ;;  %v628_v6 = vpop.f32.mrf.mxu1  ;;  %v1454_v47 = vpack.c.b16 %v1442_v59, %v1441_v28  ;;  %v1929_v28 = vunpack.c.l.b16 %v1814_v0  ;;  %v1930_v16 = vunpack.c.l.b16 %v1824_v3  ;;  %v2101_v0 = vrot.slane %v3587_v2, 5 }
  0xf2   : > { %v998_v14 = vadd.f32 %v962_v55, %v844_v45  ;;  %2668 = vmatmul.msk.bf16.gmra.mxu2 %vm462_vm3, %v2758_v49  ;;  %v629_v26 = vadd.f32 %v628_v6, %v3407_v29  ;;  %v1826_v45 = vshrl.u32 %v2686_v30, 16  ;;  %v1829_v49 = vshll.u32 %v2686_v30, 16  ;;  %v2594_v55 = vld [vmem:[%s3064_s11 + $0x3c] sm:$0xe] }
  0xf3   : > { %v2098_v6 = vsel %vm3200_vm7, %v2096_v51, %v2097_v48  ;;  %v1942_v9 = vpack.c.b16 %v1930_v16, %v1929_v28  ;;  %v2103_v28 = vrot.slane %v2101_v0, 4  ;;  %v2104_v16 = vrot.slane %v3613_v31, 5 }
  0xf4   : > { %v3589_v52 = vadd.f32 %v1296_v10, %v998_v14  ;;  %v1831_v20 = vrot.slane %v1829_v49, 5  ;;  %v2602_v14 = vrot.slane %v2594_v55, 9  ;;  %v2136_v30 = vunpack.c.l.b16 %v2098_v6  ;;  %v2689_v49 = vld [vmem:[%s3064_s11 + $0x54] sm:$0xf] }
  0xf5   : > { %v811_v39 = vpop.f32.mrf.mxu2  ;;  %v1853_v6 = vshll.u32 %v2689_v49, 16 }
  0xf6   : > { %2701 = vmatmul.msk.bf16.gmra.mxu3 %vm462_vm3, %v1941_v62  ;;  %v845_v37 = vadd.f32 %v811_v39, %v627_v40  ;;  %v1835_v40 = vshll.u32 %v3587_v2, 16  ;;  %v1410_v62 = vrot.slane %v3331_v43, 5  ;;  %v2135_v39 = vunpack.c.l.b16 %v2095_v13 }
  0xf7   : > { %v1299_v29 = vpop.f32.mrf.mxu0  ;;  %v1408_v54 = vsel %vm3200_vm7, %v2602_v14, %v1407_v11  ;;  %v1850_v13 = vshrl.u32 %v2689_v49, 16  ;;  %v1414_v2 = vrot.slane %v3344_v58, 5  ;;  %v1417_v58 = vrot.slane %v3358_v18, 5 }
  0xf8   : > { %v3609_v12 = vrot.slane %v1835_v40, 5  ;;  %v1443_v48 = vunpack.c.l.b16 %v1408_v54  ;;  %v2105_v49 = vsel %vm3200_vm7, %v2103_v28, %v2104_v16  ;;  %v2692_v28 = vld [vmem:[%s3064_s11 + $0x60] sm:$0xf] }
  0xf9   : > { %v965_v56 = vpop.f32.mrf.mxu3  ;;  %v631_v61 = vpop.f32.mrf.mxu1 }
  0xfa   : > { %2726 = vmatmul.msk.bf16.gmra.mxu0 %vm462_vm3, %v2147_v27  ;;  %v999_v10 = vadd.f32 %v965_v56, %v845_v37  ;;  %v632_v60 = vadd.f32 %v631_v61, %v3435_v35  ;;  %v1828_v35 = vrot.slane %v1826_v45, 4  ;;  %v3625_v56 = vld [vmem:[%s3064_s11 + $0x58] sm:$0xf]  ;;  %v2148_v61 = vpack.c.b16 %v2136_v30, %v2135_v39 }
  0xfb   : > { %v1852_v39 = vrot.slane %v1850_v13, 4  ;;  %v1855_v30 = vrot.slane %v1853_v6, 5 }
  0xfc   : > { %2610 = vmatmul.msk.bf16.gmra.mxu1 %vm462_vm3, %v1454_v47  ;;  %v3607_v46 = vadd.f32 %v1299_v29, %v999_v10  ;;  %v1411_v29 = vsel %vm3200_vm7, %v1409_v15, %v1410_v62  ;;  %v1832_v32 = vor.u32 %v1831_v20, %v1828_v35  ;;  %v1845_v47 = vshll.u32 %v3613_v31, 16  ;;  %v2711_v62 = vld [vmem:[%s3064_s11 + $0x48] sm:$0xe] }
  0xfd   : > { %v813_v43 = vpop.f32.mrf.mxu2  ;;  %v1444_v45 = vunpack.c.l.b16 %v1411_v29  ;;  %v1859_v35 = vshll.u32 %v3625_v56, 16  ;;  %v1863_v20 = vshrl.u32 %v3625_v56, 16 }
  0xfe   : > { %v846_v23 = vadd.f32 %v813_v43, %v629_v26  ;;  %v1842_v26 = vor.u32 %v1841_v22, %v3609_v12  ;;  %v1833_v40 = vrot.slane %v1832_v32, 4  ;;  %v1847_v55 = vrot.slane %v1845_v47, 5 }
  0xff   : > { %v1301_v59 = vpop.f32.mrf.mxu0  ;;  %v1455_v43 = vpack.c.b16 %v1444_v45, %v1443_v48  ;;  %v2719_v22 = vrot.slane %v2711_v62, 9  ;;  %v1416_v32 = vrot.slane %v1414_v2, 4 }
 0x100   : > { %v1843_v63 = vrot.slane %v1842_v26, 4  ;;  %v3648_v26 = vld [vmem:[%s3064_s11 + $0x5c] sm:$0x1] }
 0x101   : > { %v967_v27 = vpop.f32.mrf.mxu3  ;;  %v633_v37 = vpop.f32.mrf.mxu1  ;;  %v2102_v45 = vsel %vm3200_vm7, %v2719_v22, %v2101_v0  ;;  %v1869_v18 = vshll.u32 %v3648_v26, 16  ;;  %v2712_v22 = vld [vmem:[%s3064_s11 + $0x54] sm:$0xe] }
 0x102   : > { %v1000_v5 = vadd.f32 %v967_v27, %v846_v23  ;;  %2669 = vmatmul.msk.bf16.gmra.mxu2 %vm462_vm3, %v2759_v24  ;;  %v634_v51 = vadd.f32 %v633_v37, %v3455_v19  ;;  %v1848_v24 = vsel %vm3092_vm4, %v1843_v63, %v1847_v55  ;;  %v1861_v27 = vrot.slane %v1859_v35, 5 }
 0x103   : > { %v1865_v37 = vrot.slane %v1863_v20, 4  ;;  %v1932_v31 = vunpack.c.l.b16 %v1848_v24  ;;  %v2137_v0 = vunpack.c.l.b16 %v2102_v45  ;;  %v1424_v45 = vrot.slane %v3385_v1, 5 }
 0x104   : > { %v3630_v3 = vadd.f32 %v1301_v59, %v1000_v5  ;;  %v2595_v59 = vld [vmem:[%s3064_s11 + $0x48] sm:$0xe] }
 0x105   : > { %v816_v11 = vpop.f32.mrf.mxu2  ;;  %v2603_v29 = vrot.slane %v2595_v59, 9 }
 0x106   : > { %2702 = vmatmul.msk.bf16.gmra.mxu3 %vm462_vm3, %v1942_v9  ;;  %v847_v10 = vadd.f32 %v816_v11, %v632_v60  ;;  %v1838_v60 = vsel %vm3092_vm4, %v1833_v40, %v3609_v12  ;;  %v2760_v9 = vld [vmem:[%s3064_s11 + $0x48] sm:$0xff]  ;;  %v1866_v11 = vor.u32 %v1865_v37, %v1861_v27  ;;  %v2720_v37 = vrot.slane %v2712_v22, 9 }
 0x107   : > { %v1304_v19 = vpop.f32.mrf.mxu0  ;;  %v1931_v47 = vunpack.c.l.b16 %v1838_v60 }
 0x108   : > { %v1867_v6 = vrot.slane %v1866_v11, 4 }
 0x109   : > { %v970_v14 = vpop.f32.mrf.mxu3  ;;  %v636_v15 = vpop.f32.mrf.mxu1  ;;  %v1943_v62 = vpack.c.b16 %v1932_v31, %v1931_v47  ;;  %v2111_v47 = vrot.slane %v3648_v26, 5  ;;  %v2596_v31 = vld [vmem:[%s3064_s11 + $0x54] sm:$0xe] }
 0x10a   : > { %2727 = vmatmul.msk.bf16.gmra.mxu0 %vm462_vm3, %v2148_v61  ;;  %v1001_v23 = vadd.f32 %v970_v14, %v847_v10  ;;  %v1856_v61 = vor.u32 %v1855_v30, %v1852_v39  ;;  %v1418_v10 = vsel %vm3200_vm7, %v1416_v32, %v1417_v58  ;;  %v637_v35 = vadd.f32 %v636_v15, %v3412_v41  ;;  %v3669_v39 = vld [vmem:[%s3064_s11 + $0x64] sm:$0xf] }
 0x10b   : > { %v1871_v14 = vrot.slane %v1869_v18, 5  ;;  %v1874_v32 = vshrl.u32 %v2692_v28, 16 }
 0x10c   : > { %2611 = vmatmul.msk.bf16.gmra.mxu1 %vm462_vm3, %v1455_v43  ;;  %v3644_v12 = vadd.f32 %v1304_v19, %v1001_v23  ;;  %v2138_v19 = vunpack.c.l.b16 %v2105_v49  ;;  %v1857_v13 = vrot.slane %v1856_v61, 4  ;;  %v1446_v43 = vunpack.c.l.b16 %v1418_v10 }
 0x10d   : > { %v818_v54 = vpop.f32.mrf.mxu2  ;;  %v1872_v15 = vsel %vm3092_vm4, %v1867_v6, %v1871_v14  ;;  %v1876_v10 = vrot.slane %v1874_v32, 4 }
 0x10e   : > { %v848_v5 = vadd.f32 %v818_v54, %v634_v51  ;;  %v1415_v51 = vsel %vm3200_vm7, %v2603_v29, %v1414_v2  ;;  %v2108_v2 = vrot.slane %v3625_v56, 5  ;;  %v2149_v23 = vpack.c.b16 %v2138_v19, %v2137_v0  ;;  %v2761_v0 = vld [vmem:[%s3064_s11 + $0x54] sm:$0xff] }
 0x10f   : > { %v1306_v48 = vpop.f32.mrf.mxu0  ;;  %v1445_v20 = vunpack.c.l.b16 %v1415_v51  ;;  %v1862_v41 = vsel %vm3092_vm4, %v1857_v13, %v1861_v27  ;;  %v1421_v29 = vrot.slane %v3370_v42, 5  ;;  %v1883_v27 = vshll.u32 %v3669_v39, 16  ;;  %v2694_v13 = vld [vmem:[%s3064_s11 + $0x68] sm:$0x1] }
 0x110   : > { %v2110_v54 = vrot.slane %v2108_v2, 4  ;;  %v1933_v49 = vunpack.c.l.b16 %v1862_v41  ;;  %v1934_v42 = vunpack.c.l.b16 %v1872_v15  ;;  %v2109_v11 = vsel %vm3200_vm7, %v2720_v37, %v2108_v2 }
 0x111   : > { %v972_v40 = vpop.f32.mrf.mxu3  ;;  %v638_v63 = vpop.f32.mrf.mxu1  ;;  %v1456_v30 = vpack.c.b16 %v1446_v43, %v1445_v20  ;;  %v1423_v51 = vrot.slane %v1421_v29, 4  ;;  %v2139_v6 = vunpack.c.l.b16 %v2109_v11 }
 0x112   : > { %v1002_v55 = vadd.f32 %v972_v40, %v848_v5  ;;  %2670 = vmatmul.msk.bf16.gmra.mxu2 %vm462_vm3, %v2760_v9  ;;  %v1877_v5 = vshll.u32 %v2692_v28, 16  ;;  %v639_v61 = vadd.f32 %v638_v63, %v3442_v17  ;;  %v2604_v40 = vrot.slane %v2596_v31, 9 }
 0x113   : > { %v2112_v1 = vsel %vm3200_vm7, %v2110_v54, %v2111_v47  ;;  %v1885_v17 = vrot.slane %v1883_v27, 5  ;;  %v1893_v28 = vshll.u32 %v2694_v13, 16  ;;  %v2115_v31 = vrot.slane %v3669_v39, 5  ;;  %v2695_v27 = vld [vmem:[%s3064_s11 + $0x6c] sm:$0xf] }
 0x114   : > { %v3666_v16 = vadd.f32 %v1306_v48, %v1002_v55  ;;  %v1887_v48 = vshrl.u32 %v3669_v39, 16  ;;  %v1879_v55 = vrot.slane %v1877_v5, 5  ;;  %v2140_v20 = vunpack.c.l.b16 %v2112_v1  ;;  %v2713_v5 = vld [vmem:[%s3064_s11 + $0x60] sm:$0xe] }
 0x115   : > { %v821_v60 = vpop.f32.mrf.mxu2  ;;  %v1422_v14 = vsel %vm3200_vm7, %v2604_v40, %v1421_v29  ;;  %v1895_v32 = vrot.slane %v1893_v28, 5  ;;  %v2597_v40 = vld [vmem:[%s3064_s11 + $0x60] sm:$0xe]  ;;  %v1898_v39 = vshrl.u32 %v2695_v27, 16  ;;  %v1431_v1 = vrot.slane %v3418_v50, 5 }
 0x116   : > { %2703 = vmatmul.msk.bf16.gmra.mxu3 %vm462_vm3, %v1943_v62  ;;  %v849_v24 = vadd.f32 %v821_v60, %v637_v35  ;;  %v1889_v63 = vrot.slane %v1887_v48, 4  ;;  %v1425_v60 = vsel %vm3200_vm7, %v1423_v51, %v1424_v45  ;;  %v1880_v22 = vor.u32 %v1879_v55, %v1876_v10 }
 0x117   : > { %v1309_v59 = vpop.f32.mrf.mxu0  ;;  %v1448_v41 = vunpack.c.l.b16 %v1425_v60  ;;  %v2150_v15 = vpack.c.b16 %v2140_v20, %v2139_v6  ;;  %v1901_v51 = vshll.u32 %v2695_v27, 16  ;;  %v2117_v10 = vrot.slane %v2115_v31, 4 }
 0x118   : > { %v2118_v55 = vrot.slane %v2694_v13, 5  ;;  %v2762_v13 = vld [vmem:[%s3064_s11 + $0x60] sm:$0xff] }
 0x119   : > { %v975_v56 = vpop.f32.mrf.mxu3  ;;  %v641_v58 = vpop.f32.mrf.mxu1 }
 0x11a   : > { %2728 = vmatmul.msk.bf16.gmra.mxu0 %vm462_vm3, %v2149_v23  ;;  %v1003_v9 = vadd.f32 %v975_v56, %v849_v24  ;;  %v1944_v23 = vpack.c.b16 %v1934_v42, %v1933_v49  ;;  %v1890_v24 = vor.u32 %v1889_v63, %v1885_v17  ;;  %v1881_v56 = vrot.slane %v1880_v22, 4 }
 0x11b   : > { %v1428_v42 = vrot.slane %v3399_v21, 5  ;;  %v1900_v22 = vrot.slane %v1898_v39, 4 }
 0x11c   : > { %2612 = vmatmul.msk.bf16.gmra.mxu1 %vm462_vm3, %v1456_v30  ;;  %v3686_v18 = vadd.f32 %v1309_v59, %v1003_v9  ;;  %v642_v59 = vadd.f32 %v641_v58, %v3463_v8  ;;  %v1447_v30 = vunpack.c.l.b16 %v1422_v14  ;;  %v1891_v29 = vrot.slane %v1890_v24, 4  ;;  %v3705_v58 = vld [vmem:[%s3064_s11 + $0x70] sm:$0xf]  ;;  %v2697_v24 = vld [vmem:[%s3064_s11 + $0x74] sm:$0x1] }
 0x11d   : > { %v823_v26 = vpop.f32.mrf.mxu2  ;;  %v1886_v49 = vsel %vm3092_vm4, %v1881_v56, %v1885_v17  ;;  %v1430_v20 = vrot.slane %v1428_v42, 4  ;;  %v2122_v39 = vrot.slane %v3705_v58, 5 }
 0x11e   : > { %v850_v62 = vadd.f32 %v823_v26, %v639_v61  ;;  %v1457_v8 = vpack.c.b16 %v1448_v41, %v1447_v30  ;;  %v2721_v61 = vrot.slane %v2713_v5, 9  ;;  %v1896_v26 = vsel %vm3092_vm4, %v1891_v29, %v1895_v32 }
 0x11f   : > { %v1311_v19 = vpop.f32.mrf.mxu0  ;;  %v1936_v6 = vunpack.c.l.b16 %v1896_v26  ;;  %v1917_v5 = vshll.u32 %v2697_v24, 16 }
 0x120   : > { %v2116_v60 = vsel %vm3200_vm7, %v2721_v61, %v2115_v31 }
 0x121   : > { %v977_v35 = vpop.f32.mrf.mxu3  ;;  %v643_v43 = vpop.f32.mrf.mxu1 }
 0x122   : > { %v1004_v2 = vadd.f32 %v977_v35, %v850_v62  ;;  %2671 = vmatmul.msk.bf16.gmra.mxu2 %vm462_vm3, %v2761_v0  ;;  %v1907_v62 = vshll.u32 %v3705_v58, 16  ;;  %v1911_v0 = vshrl.u32 %v3705_v58, 16  ;;  %v644_v21 = vadd.f32 %v643_v43, %v3487_v4 }
 0x123   : > { %v2605_v35 = vrot.slane %v2597_v40, 9  ;;  %v2119_v4 = vsel %vm3200_vm7, %v2117_v10, %v2118_v55  ;;  %v1919_v40 = vrot.slane %v1917_v5, 5  ;;  %v2714_v10 = vld [vmem:[%s3064_s11 + $0x6c] sm:$0xe] }
 0x124   : > { %v3700_v9 = vadd.f32 %v1311_v19, %v1004_v2  ;;  %v1935_v19 = vunpack.c.l.b16 %v1886_v49  ;;  %v1903_v2 = vrot.slane %v1901_v51, 5  ;;  %v1909_v43 = vrot.slane %v1907_v62, 5 }
 0x125   : > { %v826_v37 = vpop.f32.mrf.mxu2  ;;  %v1429_v41 = vsel %vm3200_vm7, %v2605_v35, %v1428_v42 }
 0x126   : > { %2704 = vmatmul.msk.bf16.gmra.mxu3 %vm462_vm3, %v1944_v23  ;;  %v851_v54 = vadd.f32 %v826_v37, %v642_v59  ;;  %v1913_v23 = vrot.slane %v1911_v0, 4  ;;  %v2141_v59 = vunpack.c.l.b16 %v2116_v60  ;;  %v1945_v56 = vpack.c.b16 %v1936_v6, %v1935_v19 }
 0x127   : > { %v1314_v47 = vpop.f32.mrf.mxu0  ;;  %v1904_v29 = vor.u32 %v1903_v2, %v1900_v22  ;;  %v1449_v31 = vunpack.c.l.b16 %v1429_v41 }
 0x128   : > { %v1914_v32 = vor.u32 %v1913_v23, %v1909_v43 }
 0x129   : > { %v980_v48 = vpop.f32.mrf.mxu3  ;;  %v646_v45 = vpop.f32.mrf.mxu1  ;;  %v1905_v42 = vrot.slane %v1904_v29, 4 }
 0x12a   : > { %2729 = vmatmul.msk.bf16.gmra.mxu0 %vm462_vm3, %v2150_v15  ;;  %v1005_v11 = vadd.f32 %v980_v48, %v851_v54  ;;  %v1432_v15 = vsel %vm3200_vm7, %v1430_v20, %v1431_v1  ;;  %v2142_v54 = vunpack.c.l.b16 %v2119_v4  ;;  %v1915_v26 = vrot.slane %v1914_v32, 4  ;;  %v2763_v20 = vld [vmem:[%s3064_s11 + $0x6c] sm:$0xff]  ;;  %s2860_s11 = scalar_lea.hbm %s2859_s10, 128 }
 0x12b   : > { %v1450_v27 = vunpack.c.l.b16 %v1432_v15  ;;  %v1910_v62 = vsel %vm3092_vm4, %v1905_v42, %v1909_v43  ;;  %v2722_v1 = vrot.slane %v2714_v10, 9  ;;  %v3773_v10 = vld [vmem:[%s3891_s3] ss:$0 sm:$0xff]  ;;  %p2861_p13 = scmp.ne.s32.totalorder %s2859_s10, %s2860_s11  ;;  %p2866_p4 = scmp.lt.s32.totalorder %s2864_s23, %s2860_s11 }
 0x12c   : > { %2613 = vmatmul.msk.bf16.gmra.mxu1 %vm462_vm3, %v1457_v8  ;;  %v3719_v17 = vadd.f32 %v1314_v47, %v1005_v11  ;;  %v647_v47 = vadd.f32 %v646_v45, %v3422_v53  ;;  %v2151_v49 = vpack.c.b16 %v2142_v54, %v2141_v59  ;;  %v1920_v0 = vsel %vm3092_vm4, %v1915_v26, %v1919_v40 }
 0x12d   : > { %v828_v63 = vpop.f32.mrf.mxu2  ;;  %v1458_v51 = vpack.c.b16 %v1450_v27, %v1449_v31  ;;  %v2123_v22 = vsel %vm3200_vm7, %v2722_v1, %v2122_v39  ;;  %p2862_p0 = pnand %p2861_p13, %p3018_p3  ;;  %p2867_p5 = por %p2866_p4, %p2865_p2 }
 0x12e   : > { %v852_v14 = vadd.f32 %v828_v63, %v644_v21  ;;  %v2124_v21 = vrot.slane %v2122_v39, 4  ;;  %v2125_v63 = vrot.slane %v2697_v24, 5  ;;  %v2143_v43 = vunpack.c.l.b16 %v2123_v22  ;;  %v3767_v39 = vld [vmem:[%s3890_s2] ss:$0 sm:$0xff] }
 0x12f   : > { %v1316_v50 = vpop.f32.mrf.mxu0  ;;  %p2863_p1 = pneg %p2862_p0 }
 0x130   : > { %v2126_v36 = vsel %vm3200_vm7, %v2124_v21, %v2125_v63 }
 0x131   : > { %v982_v28 = vpop.f32.mrf.mxu3  ;;  %v648_v30 = vpop.f32.mrf.mxu1  ;;  %v2144_v23 = vunpack.c.l.b16 %v2126_v36  ;;  %p2868_p6 = pnand %p2867_p5, %p2863_p1 }
 0x132   : > { %v1006_v37 = vadd.f32 %v982_v28, %v852_v14  ;;  %2672 = vmatmul.msk.bf16.gmra.mxu2 %vm462_vm3, %v2762_v13  ;;  %v649_v19 = vadd.f32 %v648_v30, %v3448_v38  ;;  %v1937_v14 = vunpack.c.l.b16 %v1910_v62  ;;  %v1938_v13 = vunpack.c.l.b16 %v1920_v0 }
 0x133   : > { %v2152_v30 = vpack.c.b16 %v2144_v23, %v2143_v43 }
 0x134   : > { %v3733_v8 = vadd.f32 %v1316_v50, %v1006_v37  ;;  %v1946_v38 = vpack.c.b16 %v1938_v13, %v1937_v14 }
 0x135   : > { %v831_v48 = vpop.f32.mrf.mxu2 }
 0x136   : > { %2705 = vmatmul.msk.bf16.gmra.mxu3 %vm462_vm3, %v1945_v56  ;;  %v853_v61 = vadd.f32 %v831_v48, %v647_v47 }
 0x137   : > { %v1319_v11 = vpop.f32.mrf.mxu0 }
 0x139   : > { %v985_v55 = vpop.f32.mrf.mxu3  ;;  %v651_v53 = vpop.f32.mrf.mxu1 }
 0x13a   : > { %2730 = vmatmul.msk.bf16.gmra.mxu0 %vm462_vm3, %v2151_v49  ;;  %v1007_v45 = vadd.f32 %v985_v55, %v853_v61  ;;  %v652_v24 = vadd.f32 %v651_v53, %v3474_v57 }
 0x13c   : > { %2614 = vmatmul.msk.bf16.gmra.mxu1 %vm462_vm3, %v1458_v51  ;;  %v3745_v58 = vadd.f32 %v1319_v11, %v1007_v45 }
 0x13d   : > { %v833_v6 = vpop.f32.mrf.mxu2 }
 0x13e   : > { %v854_v35 = vadd.f32 %v833_v6, %v649_v19 }
 0x13f   : > { %v1321_v60 = vpop.f32.mrf.mxu0 }
 0x141   : > { %v987_v2 = vpop.f32.mrf.mxu3  ;;  %v653_v50 = vpop.f32.mrf.mxu1 }
 0x142   : > { %v1008_v4 = vadd.f32 %v987_v2, %v854_v35  ;;  %2673 = vmatmul.msk.bf16.gmra.mxu2 %vm462_vm3, %v2763_v20  ;;  %v654_v54 = vadd.f32 %v653_v50, %v3500_v25 }
 0x144   : > { %v3754_v28 = vadd.f32 %v1321_v60, %v1008_v4 }
 0x145   : > { %v836_v59 = vpop.f32.mrf.mxu2 }
 0x146   : > { %2706 = vmatmul.msk.bf16.gmra.mxu3 %vm462_vm3, %v1946_v38  ;;  %v855_v41 = vadd.f32 %v836_v59, %v652_v24 }
 0x147   : > { %v1324_v15 = vpop.f32.mrf.mxu0 }
 0x149   : > { %v990_v33 = vpop.f32.mrf.mxu3  ;;  %v1495_v37 = vpop.f32.mrf.mxu1 }
 0x14a   : > { %2731 = vmatmul.msk.bf16.gmra.mxu0 %vm462_vm3, %v2152_v30  ;;  %v1009_v56 = vadd.f32 %v990_v33, %v855_v41  ;;  %v1535_v48 = vadd.f32 %v1495_v37, %v3531_v7 }
 0x14c   : > { %v3759_v29 = vadd.f32 %v1324_v15, %v1009_v56 }
 0x14d   : > { %v838_v32 = vpop.f32.mrf.mxu2 }
 0x14e   : > { %v856_v57 = vadd.f32 %v838_v32, %v654_v54 }
 0x14f   : > { %v1326_v5 = vpop.f32.mrf.mxu0 }
 0x151   : > { %v992_v47 = vpop.f32.mrf.mxu3  ;;  %v1497_v31 = vpop.f32.mrf.mxu1 }
 0x152   : > { %v1010_v27 = vadd.f32 %v992_v47, %v856_v57  ;;  %v1536_v7 = vadd.f32 %v1497_v31, %v3548_v34 }
 0x154   : > { %v3762_v49 = vadd.f32 %v1326_v5, %v1010_v27 }
 0x155   : > { %v1649_v61 = vpop.f32.mrf.mxu2 }
 0x156   : > { %v1689_v42 = vadd.f32 %v1649_v61, %v1535_v48 }
 0x157   : > { %v2189_v11 = vpop.f32.mrf.mxu0 }
 0x159   : > { %v1983_v26 = vpop.f32.mrf.mxu3  ;;  %v1500_v40 = vpop.f32.mrf.mxu1 }
 0x15a   : > { %v2023_v25 = vadd.f32 %v1983_v26, %v1689_v42  ;;  %v1537_v34 = vadd.f32 %v1500_v40, %v3568_v44 }
 0x15c   : > { %v2229_v51 = vadd.f32 %v2189_v11, %v2023_v25 }
 0x15d   : > { %v1651_v55 = vpop.f32.mrf.mxu2 }
 0x15e   : > { %v2249_v53 = vmul.f32 %v3767_v39, %v2229_v51  ;;  %v1690_v45 = vadd.f32 %v1651_v55, %v1536_v7 }
 0x15f   : > { %v2191_v62 = vpop.f32.mrf.mxu0 }
 0x160   : > { %v2269_v0 = vadd.f32 %v3773_v10, %v2249_v53 }
 0x161   : > { %v1985_v1 = vpop.f32.mrf.mxu3  ;;  %v1502_v21 = vpop.f32.mrf.mxu1 }
 0x162   : > { %v2285_v63 = vmax.f32 %v2269_v0, 0.0  ;;  %v2024_v19 = vadd.f32 %v1985_v1, %v1690_v45  ;;  %v1538_v38 = vadd.f32 %v1502_v21, %v3589_v52 }
 0x164   : > { %2301 = vst [vmem:[%s3780_s13] sm:$0xff] %v2285_v63  ;;  %v2230_v6 = vadd.f32 %v2191_v62, %v2024_v19 }
 0x165   : > { %v1654_v35 = vpop.f32.mrf.mxu2 }
 0x166   : > { %v2250_v20 = vmul.f32 %v3767_v39, %v2230_v6  ;;  %v1691_v14 = vadd.f32 %v1654_v35, %v1537_v34 }
 0x167   : > { %v2194_v13 = vpop.f32.mrf.mxu0 }
 0x168   : > { %v2270_v60 = vadd.f32 %v3773_v10, %v2250_v20 }
 0x169   : > { %v1988_v22 = vpop.f32.mrf.mxu3  ;;  %v1505_v36 = vpop.f32.mrf.mxu1 }
 0x16a   : > { %v2286_v2 = vmax.f32 %v2270_v60, 0.0  ;;  %v2025_v50 = vadd.f32 %v1988_v22, %v1691_v14  ;;  %v1539_v56 = vadd.f32 %v1505_v36, %v3607_v46 }
 0x16c   : > { %2302 = vst [vmem:[%s3780_s13 + $0x8] sm:$0xff] %v2286_v2  ;;  %v2231_v4 = vadd.f32 %v2194_v13, %v2025_v50 }
 0x16d   : > { %v1656_v43 = vpop.f32.mrf.mxu2 }
 0x16e   : > { %v2251_v23 = vmul.f32 %v3767_v39, %v2231_v4  ;;  %v1692_v44 = vadd.f32 %v1656_v43, %v1538_v38 }
 0x16f   : > { %v2196_v24 = vpop.f32.mrf.mxu0 }
 0x170   : > { %v2271_v59 = vadd.f32 %v3773_v10, %v2251_v23 }
 0x171   : > { %v1990_v30 = vpop.f32.mrf.mxu3  ;;  %v1507_v41 = vpop.f32.mrf.mxu1 }
 0x172   : > { %v2287_v15 = vmax.f32 %v2271_v59, 0.0  ;;  %v2026_v33 = vadd.f32 %v1990_v30, %v1692_v44  ;;  %v1540_v42 = vadd.f32 %v1507_v41, %v3630_v3 }
 0x174   : > { %2303 = vst [vmem:[%s3780_s13 + $0x10] sm:$0xff] %v2287_v15  ;;  %v2232_v37 = vadd.f32 %v2196_v24, %v2026_v33 }
 0x175   : > { %v1659_v54 = vpop.f32.mrf.mxu2 }
 0x176   : > { %v2252_v32 = vmul.f32 %v3767_v39, %v2232_v37  ;;  %v1693_v52 = vadd.f32 %v1659_v54, %v1539_v56 }
 0x177   : > { %v2199_v57 = vpop.f32.mrf.mxu0 }
 0x178   : > { %v2272_v5 = vadd.f32 %v3773_v10, %v2252_v32 }
 0x179   : > { %v1993_v47 = vpop.f32.mrf.mxu3  ;;  %v1510_v31 = vpop.f32.mrf.mxu1 }
 0x17a   : > { %v2288_v27 = vmax.f32 %v2272_v5, 0.0  ;;  %v2027_v48 = vadd.f32 %v1993_v47, %v1693_v52  ;;  %v1541_v62 = vadd.f32 %v1510_v31, %v3644_v12 }
 0x17c   : > { %2304 = vst [vmem:[%s3780_s13 + $0x18] sm:$0xff] %v2288_v27  ;;  %v2233_v61 = vadd.f32 %v2199_v57, %v2027_v48 }
 0x17d   : > { %v1661_v11 = vpop.f32.mrf.mxu2 }
 0x17e   : > { %v2253_v26 = vmul.f32 %v3767_v39, %v2233_v61  ;;  %v1694_v46 = vadd.f32 %v1661_v11, %v1540_v42 }
 0x17f   : > { %v2201_v40 = vpop.f32.mrf.mxu0 }
 0x180   : > { %v2273_v25 = vadd.f32 %v3773_v10, %v2253_v26 }
 0x181   : > { %v1995_v51 = vpop.f32.mrf.mxu3  ;;  %v1512_v7 = vpop.f32.mrf.mxu1 }
 0x182   : > { %v2289_v55 = vmax.f32 %v2273_v25, 0.0  ;;  %v2028_v53 = vadd.f32 %v1995_v51, %v1694_v46  ;;  %v1542_v14 = vadd.f32 %v1512_v7, %v3666_v16 }
 0x184   : > { %2305 = vst [vmem:[%s3780_s13 + $0x20] sm:$0xff] %v2289_v55  ;;  %v2234_v45 = vadd.f32 %v2201_v40, %v2028_v53 }
 0x185   : > { %v1664_v0 = vpop.f32.mrf.mxu2 }
 0x186   : > { %v2254_v1 = vmul.f32 %v3767_v39, %v2234_v45  ;;  %v1695_v3 = vadd.f32 %v1664_v0, %v1541_v62 }
 0x187   : > { %v2204_v21 = vpop.f32.mrf.mxu0 }
 0x188   : > { %v2274_v63 = vadd.f32 %v3773_v10, %v2254_v1 }
 0x189   : > { %v1998_v19 = vpop.f32.mrf.mxu3  ;;  %v1515_v6 = vpop.f32.mrf.mxu1 }
 0x18a   : > { %v2290_v34 = vmax.f32 %v2274_v63, 0.0  ;;  %v2029_v35 = vadd.f32 %v1998_v19, %v1695_v3  ;;  %v1543_v23 = vadd.f32 %v1515_v6, %v3686_v18 }
 0x18c   : > { %2306 = vst [vmem:[%s3780_s13 + $0x28] sm:$0xff] %v2290_v34  ;;  %v2235_v20 = vadd.f32 %v2204_v21, %v2029_v35 }
 0x18d   : > { %v1666_v13 = vpop.f32.mrf.mxu2 }
 0x18e   : > { %v2255_v60 = vmul.f32 %v3767_v39, %v2235_v20  ;;  %v1696_v12 = vadd.f32 %v1666_v13, %v1542_v14 }
 0x18f   : > { %v2206_v22 = vpop.f32.mrf.mxu0 }
 0x190   : > { %v2275_v36 = vadd.f32 %v3773_v10, %v2255_v60 }
 0x191   : > { %v2000_v2 = vpop.f32.mrf.mxu3  ;;  %v1517_v50 = vpop.f32.mrf.mxu1 }
 0x192   : > { %v2291_v4 = vmax.f32 %v2275_v36, 0.0  ;;  %v2030_v38 = vadd.f32 %v2000_v2, %v1696_v12  ;;  %v1544_v54 = vadd.f32 %v1517_v50, %v3700_v9 }
 0x194   : > { %2307 = vst [vmem:[%s3780_s13 + $0x30] sm:$0xff] %v2291_v4  ;;  %v2236_v43 = vadd.f32 %v2206_v22, %v2030_v38 }
 0x195   : > { %v1669_v44 = vpop.f32.mrf.mxu2 }
 0x196   : > { %v2256_v24 = vmul.f32 %v3767_v39, %v2236_v43  ;;  %v1697_v16 = vadd.f32 %v1669_v44, %v1543_v23 }
 0x197   : > { %v2209_v59 = vpop.f32.mrf.mxu0 }
 0x198   : > { %v2276_v30 = vadd.f32 %v3773_v10, %v2256_v24 }
 0x199   : > { %v2003_v41 = vpop.f32.mrf.mxu3  ;;  %v1520_v15 = vpop.f32.mrf.mxu1 }
 0x19a   : > { %v2292_v33 = vmax.f32 %v2276_v30, 0.0  ;;  %v2031_v37 = vadd.f32 %v2003_v41, %v1697_v16  ;;  %v1545_v42 = vadd.f32 %v1520_v15, %v3719_v17 }
 0x19c   : > { %2308 = vst [vmem:[%s3780_s13 + $0x38] sm:$0xff] %v2292_v33  ;;  %v2237_v56 = vadd.f32 %v2209_v59, %v2031_v37 }
 0x19d   : > { %v1671_v32 = vpop.f32.mrf.mxu2 }
 0x19e   : > { %v2257_v52 = vmul.f32 %v3767_v39, %v2237_v56  ;;  %v1698_v18 = vadd.f32 %v1671_v32, %v1544_v54 }
 0x19f   : > { %v2211_v57 = vpop.f32.mrf.mxu0 }
 0x1a0   : > { %v2277_v5 = vadd.f32 %v3773_v10, %v2257_v52 }
 0x1a1   : > { %v2005_v47 = vpop.f32.mrf.mxu3  ;;  %v1522_v31 = vpop.f32.mrf.mxu1 }
 0x1a2   : > { %v2293_v27 = vmax.f32 %v2277_v5, 0.0  ;;  %v2032_v48 = vadd.f32 %v2005_v47, %v1698_v18  ;;  %v1546_v45 = vadd.f32 %v1522_v31, %v3733_v8 }
 0x1a4   : > { %2309 = vst [vmem:[%s3780_s13 + $0x40] sm:$0xff] %v2293_v27  ;;  %v2238_v61 = vadd.f32 %v2211_v57, %v2032_v48 }
 0x1a5   : > { %v1674_v11 = vpop.f32.mrf.mxu2 }
 0x1a6   : > { %v2258_v26 = vmul.f32 %v3767_v39, %v2238_v61  ;;  %v1699_v9 = vadd.f32 %v1674_v11, %v1545_v42 }
 0x1a7   : > { %v2214_v46 = vpop.f32.mrf.mxu0 }
 0x1a8   : > { %v2278_v40 = vadd.f32 %v3773_v10, %v2258_v26 }
 0x1a9   : > { %v2008_v25 = vpop.f32.mrf.mxu3  ;;  %v1525_v55 = vpop.f32.mrf.mxu1 }
 0x1aa   : > { %v2294_v51 = vmax.f32 %v2278_v40, 0.0  ;;  %v2033_v7 = vadd.f32 %v2008_v25, %v1699_v9  ;;  %v1547_v34 = vadd.f32 %v1525_v55, %v3745_v58 }
 0x1ac   : > { %2310 = vst [vmem:[%s3780_s13 + $0x48] sm:$0xff] %v2294_v51  ;;  %v2239_v53 = vadd.f32 %v2214_v46, %v2033_v7 }
 0x1ad   : > { %v1676_v62 = vpop.f32.mrf.mxu2 }
 0x1ae   : > { %v2259_v0 = vmul.f32 %v3767_v39, %v2239_v53  ;;  %v1700_v17 = vadd.f32 %v1676_v62, %v1546_v45 }
 0x1af   : > { %v2216_v1 = vpop.f32.mrf.mxu0 }
 0x1b0   : > { %v2279_v3 = vadd.f32 %v3773_v10, %v2259_v0 }
 0x1b1   : > { %v2010_v21 = vpop.f32.mrf.mxu3  ;;  %v1527_v35 = vpop.f32.mrf.mxu1 }
 0x1b2   : > { %v2295_v63 = vmax.f32 %v2279_v3, 0.0  ;;  %v2034_v19 = vadd.f32 %v2010_v21, %v1700_v17  ;;  %v1548_v50 = vadd.f32 %v1527_v35, %v3754_v28 }
 0x1b4   : > { %2311 = vst [vmem:[%s3780_s13 + $0x50] sm:$0xff] %v2295_v63  ;;  %v2240_v6 = vadd.f32 %v2216_v1, %v2034_v19 }
 0x1b5   : > { %v1679_v20 = vpop.f32.mrf.mxu2 }
 0x1b6   : > { %v2260_v14 = vmul.f32 %v3767_v39, %v2240_v6  ;;  %v1701_v8 = vadd.f32 %v1679_v20, %v1547_v34 }
 0x1b7   : > { %v2219_v13 = vpop.f32.mrf.mxu0 }
 0x1b8   : > { %v2280_v60 = vadd.f32 %v3773_v10, %v2260_v14 }
 0x1b9   : > { %v2013_v12 = vpop.f32.mrf.mxu3  ;;  %v1530_v43 = vpop.f32.mrf.mxu1 }
 0x1ba   : > { %v2296_v22 = vmax.f32 %v2280_v60, 0.0  ;;  %v2035_v36 = vadd.f32 %v2013_v12, %v1701_v8  ;;  %v1549_v41 = vadd.f32 %v1530_v43, %v3759_v29 }
 0x1bc   : > { %2312 = vst [vmem:[%s3780_s13 + $0x58] sm:$0xff] %v2296_v22  ;;  %v2241_v2 = vadd.f32 %v2219_v13, %v2035_v36 }
 0x1bd   : > { %v1681_v4 = vpop.f32.mrf.mxu2 }
 0x1be   : > { %v2261_v38 = vmul.f32 %v3767_v39, %v2241_v2  ;;  %v1702_v58 = vadd.f32 %v1681_v4, %v1548_v50 }
 0x1bf   : > { %v2221_v23 = vpop.f32.mrf.mxu0 }
 0x1c0   : > { %v2281_v44 = vadd.f32 %v3773_v10, %v2261_v38 }
 0x1c1   : > { %v2015_v24 = vpop.f32.mrf.mxu3  ;;  %v1532_v56 = vpop.f32.mrf.mxu1 }
 0x1c2   : > { %v2297_v16 = vmax.f32 %v2281_v44, 0.0  ;;  %v2036_v59 = vadd.f32 %v2015_v24, %v1702_v58  ;;  %v1550_v5 = vadd.f32 %v1532_v56, %v3762_v49 }
 0x1c4   : > { %2313 = vst [vmem:[%s3780_s13 + $0x60] sm:$0xff] %v2297_v16  ;;  %v2242_v30 = vadd.f32 %v2221_v23, %v2036_v59 }
 0x1c5   : > { %v1684_v15 = vpop.f32.mrf.mxu2 }
 0x1c6   : > { %v2262_v28 = vmul.f32 %v3767_v39, %v2242_v30  ;;  %v1703_v33 = vadd.f32 %v1684_v15, %v1549_v41 }
 0x1c7   : > { %v2224_v54 = vpop.f32.mrf.mxu0 }
 0x1c8   : > { %v2282_v37 = vadd.f32 %v3773_v10, %v2262_v28 }
 0x1c9   : > { %v2018_v32 = vpop.f32.mrf.mxu3 }
 0x1ca   : > { %v2298_v52 = vmax.f32 %v2282_v37, 0.0  ;;  %v2037_v18 = vadd.f32 %v2018_v32, %v1703_v33 }
 0x1cc   : > { %2314 = vst [vmem:[%s3780_s13 + $0x68] sm:$0xff] %v2298_v52  ;;  %v2243_v57 = vadd.f32 %v2224_v54, %v2037_v18 }
 0x1cd   : > { %v1686_v29 = vpop.f32.mrf.mxu2 }
 0x1ce   : > { %v2263_v47 = vmul.f32 %v3767_v39, %v2243_v57  ;;  %v1704_v31 = vadd.f32 %v1686_v29, %v1550_v5 }
 0x1cf   : > { %v2226_v11 = vpop.f32.mrf.mxu0 }
 0x1d0   : > { %v2283_v27 = vadd.f32 %v3773_v10, %v2263_v47 }
 0x1d1   : > { %v2020_v48 = vpop.f32.mrf.mxu3 }
 0x1d2   : > { %v2299_v61 = vmax.f32 %v2283_v27, 0.0  ;;  %v2038_v42 = vadd.f32 %v2020_v48, %v1704_v31 }
 0x1d4   : > { %2315 = vst [vmem:[%s3780_s13 + $0x70] sm:$0xff] %v2299_v61  ;;  %v2244_v26 = vadd.f32 %v2226_v11, %v2038_v42 }
 0x1d6   : > { %v2264_v49 = vmul.f32 %v3767_v39, %v2244_v26 }
 0x1d8   : > { %v2284_v9 = vadd.f32 %v3773_v10, %v2264_v49 }
 0x1da   : > { %v2300_v46 = vmax.f32 %v2284_v9, 0.0 }
 0x1dc   : > { %2316 = vst [vmem:[%s3780_s13 + $0x78] sm:$0xff] %v2300_v46 }
 0x1dd   : > { %2871 = shalt.err (!%p2868_p6)
}
 0x1de   : > { %s2940_s9 = smov 128   ;;  %s2941_s13 = smov 8  }
 0x1df   : > { %2769 = dma.vmem_to_hbm [thread:$0]  (%p3018_p3), %s2334_s5, 2048, %s2336_s6, %s2318_s8, %s2940_s9, %s2940_s9, %s2941_s13  }
 0x1e0 PF: > { %p2775_p7 = scmp.ge.s32.totalorder %s2938_s22, 2  ;;  %s2350_s18 = sand.u32 1, %s2910_s15  }
 0x1e1   : > { %s2351_s19 = scalar_lea.sflag [#allocation3], %s2350_s18 }
 0x1e2   : > { %p2772_p9 = pnand %p2775_p7, %p3027_p8 }
 0x1e4   : > { %p2773_p10 = pneg %p2772_p9 }
 0x1e6   : > { %2905 = dma.done.wait (%p2773_p10), %s2351_s19, 2048  }
 0x1e7   : > { %2907 = vsyncadd (%p2773_p10), %s2351_s19, 4294965248  ;;  %s17_s22 = sadd.s32 1, %s2938_s22   ;;  %s3899_s15 = smov %s2914_s16 }
 0x1e8   : > { %p14_p11 = scmp.ge.s32.totalorder %s17_s22, 6   ;;  %s3900_s16 = smov %s2918_s17 }
 0x1e9   : > { %s3901_s17 = smov %s3036_s7  ;;  %s3902_s18 = smov %s2930_s20 }
 0x1ea   : > { %s3903_s19 = smov %s2934_s21  ;;  %s3904_s20 = smov %s3907_s25 }
 0x1eb   : > { %s3905_s21 = smov %s3911_s26  ;;  %16 = sbr.rel (!%p14_p11) target bundleno = 5 (0x5), region = 82 }
 0x1f0   :  { %2357 = vsyncpa [#allocation3], 1 }
 0x1f1   :  { %2359 = vsyncpa [#allocation3 + $0x1], 1 }

</bundles_post_ra>
